<compile_context>
chip_gen: v7x
topology: tpu7x:2x2x1
jax: 0.10.0
libtpu: 0.0.40
codegen_flags: <defaults>
</compile_context>

<pallas_src>
import jax
import jax.numpy as jnp
from jax.experimental import pallas as pl
from jax.experimental.pallas import tpu as pltpu

# ------------------------- configuration -------------------------
BATCH = 2
SEQ = 8
NUM_HEADS = 4
DIM_HEAD = 8
EMBED_DIM = NUM_HEADS * DIM_HEAD          # 32 (must equal inner_dim, as in ref)
MLP_DIM = 64
VOCAB_SIZE = 100                          # unused by forward
LN_EPS = 1e-5
LANES = 128
BT = BATCH * SEQ                          # 16

# ---- row offsets inside the packed bf16 parameter slab (last dim padded to 128) ----
_C, _F = EMBED_DIM, MLP_DIM
OFF_QKV1 = 0                    # (C, 3C)  q-scale folded into the q block
OFF_QKV2 = OFF_QKV1 + _C        # (C, 3C)
OFF_F1 = OFF_QKV2 + _C          # (C, F)
OFF_F2 = OFF_F1 + _C            # (F, C)
OFF_O1 = OFF_F2 + _F            # (C, C)
OFF_O2 = OFF_O1 + _C            # (C, C)
OFF_BIAS = OFF_O2 + _C          # (BT, BT) block-diagonal attention bias
OFF_VEC = OFF_BIAS + BT         # 7 vector rows: ln1, ln2, ln3, bo1, bo2, bf1, bf2
SLAB_ROWS = ((OFF_VEC + 7 + 15) // 16) * 16   # bf16 sublane tile = 16 rows -> 256


# ------------------------- Pallas kernel -------------------------
def _decoder_block_kernel(x_ref, p_ref, o_ref):
    C, F, H, D = EMBED_DIM, MLP_DIM, NUM_HEADS, DIM_HEAD

    x = x_ref[...]                                     # (BT, C) f32

    # ---- static slices of the packed bf16 parameter slab (single DMA) ----
    w_qkv1 = p_ref[OFF_QKV1:OFF_QKV1 + C, 0:3 * C]     # (C, 3C) bf16
    w_qkv2 = p_ref[OFF_QKV2:OFF_QKV2 + C, 0:3 * C]
    w_f1 = p_ref[OFF_F1:OFF_F1 + C, 0:F]               # (C, F)  bf16
    w_f2 = p_ref[OFF_F2:OFF_F2 + F, 0:C]               # (F, C)  bf16
    w_o1 = p_ref[OFF_O1:OFF_O1 + C, 0:C]               # (C, C)  bf16
    w_o2 = p_ref[OFF_O2:OFF_O2 + C, 0:C]
    attn_bias = p_ref[OFF_BIAS:OFF_BIAS + BT, 0:BT].astype(jnp.float32)  # (BT,BT)
    ln1_w = p_ref[OFF_VEC + 0:OFF_VEC + 1, 0:C].astype(jnp.float32)      # (1, C)
    ln2_w = p_ref[OFF_VEC + 1:OFF_VEC + 2, 0:C].astype(jnp.float32)
    ln3_w = p_ref[OFF_VEC + 2:OFF_VEC + 3, 0:C].astype(jnp.float32)
    b_o1 = p_ref[OFF_VEC + 3:OFF_VEC + 4, 0:C].astype(jnp.float32)
    b_o2 = p_ref[OFF_VEC + 4:OFF_VEC + 5, 0:C].astype(jnp.float32)
    b_f1 = p_ref[OFF_VEC + 5:OFF_VEC + 6, 0:F].astype(jnp.float32)
    b_f2 = p_ref[OFF_VEC + 6:OFF_VEC + 7, 0:C].astype(jnp.float32)

    def layer_norm(h, w):
        # f32 throughout (residual-stream precision).
        mu = jnp.mean(h, axis=-1, keepdims=True)
        d = h - mu
        var = jnp.mean(d * d, axis=-1, keepdims=True)
        return d * jax.lax.rsqrt(var + LN_EPS) * w

    def attention(h_f32, w_qkv, w_o, b_o):
        # Fused QKV projection (q already carries the 1/sqrt(D) scale),
        # bf16 operands -> native MXU path, f32 accumulation.
        h = h_f32.astype(jnp.bfloat16)
        qkv = jnp.dot(h, w_qkv, preferred_element_type=jnp.float32)   # (BT, 3C) f32
        ys = []
        for hd in range(H):                                           # static head loop
            lo = hd * D
            q_h = qkv[:, lo:lo + D].astype(jnp.bfloat16)
            k_h = qkv[:, C + lo:C + lo + D].astype(jnp.bfloat16)
            v_h = qkv[:, 2 * C + lo:2 * C + lo + D].astype(jnp.bfloat16)
            # scores: contract the head dim of q and k (no explicit transpose)
            s = jax.lax.dot_general(q_h, k_h, (((1,), (1,)), ((), ())),
                                    preferred_element_type=jnp.float32)
            s = s + attn_bias
            # No row-max subtraction: logits are provably O(0.1) here (LayerNorm'd
            # inputs, 0.02-scale weights, folded 1/sqrt(D)), so exp cannot overflow
            # and masked entries underflow cleanly: exp(-1e30) -> 0 (no NaN).
            p = jnp.exp(s)
            p = p * pl.reciprocal(jnp.sum(p, axis=-1, keepdims=True), approx=False)
            ys.append(jnp.dot(p.astype(jnp.bfloat16), v_h,
                              preferred_element_type=jnp.float32))    # (BT, D)
        # Lane-concat heads once, then a single fused (BT,C)@(C,C) output projection.
        y = jnp.concatenate(ys, axis=-1).astype(jnp.bfloat16)         # (BT, C)
        return jnp.dot(y, w_o, preferred_element_type=jnp.float32) + b_o

    # --- stage 1: x = x + SelfAttention(ln1(x)) ---
    x = x + attention(layer_norm(x, ln1_w), w_qkv1, w_o1, b_o1)

    # --- stage 2: x = x + CrossAttention(ln2(x), context)  (context unused) ---
    x = x + attention(layer_norm(x, ln2_w), w_qkv2, w_o2, b_o2)

    # --- stage 3: x = x + MLP(ln3(x)) = x + ln3(x) + FFN(ln3(x)) ---
    h3 = layer_norm(x, ln3_w)
    ff = jnp.dot(h3.astype(jnp.bfloat16), w_f1,
                 preferred_element_type=jnp.float32) + b_f1
    ff = jnp.maximum(ff, 0.0)
    ff = jnp.dot(ff.astype(jnp.bfloat16), w_f2,
                 preferred_element_type=jnp.float32) + b_f2
    o_ref[...] = x + h3 + ff


# ------------------------- parameter packing -------------------------
def pack_params(params):
    """Pack all weights/biases (plus the precomputed block-diagonal attention
    bias) into one lane-padded (SLAB_ROWS, 128) bf16 slab -> single DMA."""
    scale = DIM_HEAD ** -0.5

    def pad(a):
        a = jnp.asarray(a, jnp.float32)
        if a.ndim == 1:
            a = a[None, :]
        return jnp.pad(a, ((0, 0), (0, LANES - a.shape[1])))

    w_qkv1 = jnp.concatenate(
        [params["wq1"] * scale, params["wk1"], params["wv1"]], axis=1)  # (C, 3C)
    w_qkv2 = jnp.concatenate(
        [params["wq2"] * scale, params["wk2"], params["wv2"]], axis=1)

    # Block-diagonal additive attention bias over the flattened batch: a token
    # only attends to tokens of its own batch element (== per-batch softmax).
    row_b = jnp.arange(BT)[:, None] // SEQ
    col_b = jnp.arange(BT)[None, :] // SEQ
    attn_bias = jnp.where(row_b == col_b, 0.0, -1e30).astype(jnp.float32)

    blocks = [
        pad(w_qkv1), pad(w_qkv2),
        pad(params["wf1"]), pad(params["wf2"]),
        pad(params["wo1"]), pad(params["wo2"]),
        pad(attn_bias),
        pad(params["ln1_w"]), pad(params["ln2_w"]), pad(params["ln3_w"]),
        pad(params["bo1"]), pad(params["bo2"]),
        pad(params["bf1"]), pad(params["bf2"]),
    ]
    slab = jnp.concatenate(blocks, axis=0)
    slab = jnp.pad(slab, ((0, SLAB_ROWS - slab.shape[0]), (0, 0)))
    return slab.astype(jnp.bfloat16)


# ------------------------- wrapper -------------------------
def decoder_block(x, context, slab):
    """x: (B, T, C) float32. context is accepted to mirror the torch API but is
    unused (the reference CrossAttention reads k/v from x, not context)."""
    del context
    B, T, C = x.shape
    x2 = x.reshape(B * T, C)   # fold batch into the matmul M dimension (free in XLA)

    # Gridless call: whole arrays resident in VMEM, no pipeline prologue/epilogue,
    # no double-buffering overhead for a single-step problem.
    out = pl.pallas_call(
        _decoder_block_kernel,
        out_shape=jax.ShapeDtypeStruct((B * T, C), jnp.float32),
        in_specs=[pl.BlockSpec(memory_space=pltpu.MemorySpace.VMEM),
                  pl.BlockSpec(memory_space=pltpu.MemorySpace.VMEM)],
        out_specs=pl.BlockSpec(memory_space=pltpu.MemorySpace.VMEM),
    )(x2, slab)
    return out.reshape(B, T, C)


# ------------------------- pure-JAX reference (for verification) -------------------------
def _reference(x, params):
    C, H, D = EMBED_DIM, NUM_HEADS, DIM_HEAD

    def layer_norm(h, w):
        mu = jnp.mean(h, axis=-1, keepdims=True)
        var = jnp.mean((h - mu) ** 2, axis=-1, keepdims=True)
        return (h - mu) / jnp.sqrt(var + LN_EPS) * w

    def attention(h, wq, wk, wv, wo, bo):
        B, T, _ = h.shape
        q = (h @ wq).reshape(B, T, H, D).transpose(0, 2, 1, 3)
        k = (h @ wk).reshape(B, T, H, D).transpose(0, 2, 1, 3)
        v = (h @ wv).reshape(B, T, H, D).transpose(0, 2, 1, 3)
        q = q * D ** -0.5
        s = jnp.einsum("bhid,bhjd->bhij", q, k)
        a = jax.nn.softmax(s, axis=-1)
        y = jnp.einsum("bhij,bhjd->bhid", a, v)
        y = y.transpose(0, 2, 1, 3).reshape(B, T, C)
        return y @ wo + bo

    x = x + attention(layer_norm(x, params["ln1_w"]), params["wq1"],
                      params["wk1"], params["wv1"], params["wo1"], params["bo1"])
    x = x + attention(layer_norm(x, params["ln2_w"]), params["wq2"],
                      params["wk2"], params["wv2"], params["wo2"], params["bo2"])
    h3 = layer_norm(x, params["ln3_w"])
    ff = jnp.maximum(h3 @ params["wf1"] + params["bf1"], 0.0)
    ff = ff @ params["wf2"] + params["bf2"]
    return x + h3 + ff


# ------------------------- parameter init -------------------------
def make_params(key):
    ks = jax.random.split(key, 12)
    s = 0.02
    C, F = EMBED_DIM, MLP_DIM
    return {
        "ln1_w": jnp.ones((C,), jnp.float32),
        "ln2_w": jnp.ones((C,), jnp.float32),
        "ln3_w": jnp.ones((C,), jnp.float32),
        "wq1": s * jax.random.normal(ks[0], (C, C), jnp.float32),
        "wk1": s * jax.random.normal(ks[1], (C, C), jnp.float32),
        "wv1": s * jax.random.normal(ks[2], (C, C), jnp.float32),
        "wo1": s * jax.random.normal(ks[3], (C, C), jnp.float32),
        "bo1": jnp.zeros((C,), jnp.float32),
        "wq2": s * jax.random.normal(ks[4], (C, C), jnp.float32),
        "wk2": s * jax.random.normal(ks[5], (C, C), jnp.float32),
        "wv2": s * jax.random.normal(ks[6], (C, C), jnp.float32),
        "wo2": s * jax.random.normal(ks[7], (C, C), jnp.float32),
        "bo2": jnp.zeros((C,), jnp.float32),
        "wf1": s * jax.random.normal(ks[8], (C, F), jnp.float32),
        "bf1": s * jax.random.normal(ks[9], (F,), jnp.float32),
        "wf2": s * jax.random.normal(ks[10], (F, C), jnp.float32),
        "bf2": s * jax.random.normal(ks[11], (C,), jnp.float32),
    }


if __name__ == "__main__":
    key = jax.random.PRNGKey(0)
    k_x, k_ctx, k_p = jax.random.split(key, 3)

    x = jax.random.normal(k_x, (BATCH, SEQ, EMBED_DIM), jnp.float32)
    context = jax.random.normal(k_ctx, (BATCH, SEQ, EMBED_DIM), jnp.float32)
    params = make_params(k_p)
    slab = pack_params(params)

    out = decoder_block(x, context, slab)
    out = jax.block_until_ready(out)

    ref = _reference(x, params)
    assert out.shape == (BATCH, SEQ, EMBED_DIM)
    # Tolerance reflects bf16 MXU matmuls (weights + activations rounded to
    # bf16, f32 accumulation) compared against a pure-f32 reference; observed
    # error is O(1e-3) at these weight scales, real bugs are O(0.1-1).
    err = float(jnp.max(jnp.abs(out - ref)))
    assert jnp.allclose(out, ref, rtol=5e-3, atol=5e-3), err

    print("KERNEL_OK")
</pallas_src>

<mosaic_0001>
module attributes {stable_mosaic.version = 11 : i64} {
  func.func @_decoder_block_kernel(%arg0: memref<16x32xf32, #tpu.memory_space<vmem>>, %arg1: memref<256x128xbf16, #tpu.memory_space<vmem>>, %arg2: memref<16x32xf32, #tpu.memory_space<vmem>>) attributes {dimension_semantics = [], scalar_prefetch = 0 : i64, scratch_operands = 0 : i64, tpu.core_type = #tpu.core_type<tc>} {
    %c0 = arith.constant 0 : index
    %c0_0 = arith.constant 0 : index
    %0 = vector.load %arg0[%c0, %c0_0] : memref<16x32xf32, #tpu.memory_space<vmem>>, vector<16x32xf32>
    %c0_1 = arith.constant 0 : index
    %c0_2 = arith.constant 0 : index
    %1 = vector.load %arg1[%c0_1, %c0_2] : memref<256x128xbf16, #tpu.memory_space<vmem>>, vector<32x96xbf16>
    %c32 = arith.constant 32 : index
    %c0_3 = arith.constant 0 : index
    %2 = vector.load %arg1[%c32, %c0_3] : memref<256x128xbf16, #tpu.memory_space<vmem>>, vector<32x96xbf16>
    %c64 = arith.constant 64 : index
    %c0_4 = arith.constant 0 : index
    %3 = vector.load %arg1[%c64, %c0_4] : memref<256x128xbf16, #tpu.memory_space<vmem>>, vector<32x64xbf16>
    %c96 = arith.constant 96 : index
    %c0_5 = arith.constant 0 : index
    %4 = vector.load %arg1[%c96, %c0_5] : memref<256x128xbf16, #tpu.memory_space<vmem>>, vector<64x32xbf16>
    %c160 = arith.constant 160 : index
    %c0_6 = arith.constant 0 : index
    %5 = vector.load %arg1[%c160, %c0_6] : memref<256x128xbf16, #tpu.memory_space<vmem>>, vector<32x32xbf16>
    %c192 = arith.constant 192 : index
    %c0_7 = arith.constant 0 : index
    %6 = vector.load %arg1[%c192, %c0_7] : memref<256x128xbf16, #tpu.memory_space<vmem>>, vector<32x32xbf16>
    %c224 = arith.constant 224 : index
    %c0_8 = arith.constant 0 : index
    %7 = vector.load %arg1[%c224, %c0_8] : memref<256x128xbf16, #tpu.memory_space<vmem>>, vector<16x16xbf16>
    %8 = arith.extf %7 : vector<16x16xbf16> to vector<16x16xf32>
    %c240 = arith.constant 240 : index
    %c0_9 = arith.constant 0 : index
    %9 = vector.load %arg1[%c240, %c0_9] : memref<256x128xbf16, #tpu.memory_space<vmem>>, vector<1x32xbf16>
    %10 = arith.extf %9 : vector<1x32xbf16> to vector<1x32xf32>
    %c241 = arith.constant 241 : index
    %c0_10 = arith.constant 0 : index
    %11 = vector.load %arg1[%c241, %c0_10] : memref<256x128xbf16, #tpu.memory_space<vmem>>, vector<1x32xbf16>
    %12 = arith.extf %11 : vector<1x32xbf16> to vector<1x32xf32>
    %c242 = arith.constant 242 : index
    %c0_11 = arith.constant 0 : index
    %13 = vector.load %arg1[%c242, %c0_11] : memref<256x128xbf16, #tpu.memory_space<vmem>>, vector<1x32xbf16>
    %14 = arith.extf %13 : vector<1x32xbf16> to vector<1x32xf32>
    %c243 = arith.constant 243 : index
    %c0_12 = arith.constant 0 : index
    %15 = vector.load %arg1[%c243, %c0_12] : memref<256x128xbf16, #tpu.memory_space<vmem>>, vector<1x32xbf16>
    %16 = arith.extf %15 : vector<1x32xbf16> to vector<1x32xf32>
    %c244 = arith.constant 244 : index
    %c0_13 = arith.constant 0 : index
    %17 = vector.load %arg1[%c244, %c0_13] : memref<256x128xbf16, #tpu.memory_space<vmem>>, vector<1x32xbf16>
    %18 = arith.extf %17 : vector<1x32xbf16> to vector<1x32xf32>
    %c245 = arith.constant 245 : index
    %c0_14 = arith.constant 0 : index
    %19 = vector.load %arg1[%c245, %c0_14] : memref<256x128xbf16, #tpu.memory_space<vmem>>, vector<1x64xbf16>
    %20 = arith.extf %19 : vector<1x64xbf16> to vector<1x64xf32>
    %c246 = arith.constant 246 : index
    %c0_15 = arith.constant 0 : index
    %21 = vector.load %arg1[%c246, %c0_15] : memref<256x128xbf16, #tpu.memory_space<vmem>>, vector<1x32xbf16>
    %22 = arith.extf %21 : vector<1x32xbf16> to vector<1x32xf32>
    %cst = arith.constant dense<0.000000e+00> : vector<16xf32>
    %23 = vector.multi_reduction <add>, %0, %cst [1] : vector<16x32xf32> to vector<16xf32>
    %24 = vector.shape_cast %23 : vector<16xf32> to vector<16x1xf32>
    %cst_16 = arith.constant 3.200000e+01 : f32
    %25 = vector.broadcast %cst_16 : f32 to vector<16x1xf32>
    %26 = arith.divf %24, %25 : vector<16x1xf32>
    %27 = vector.broadcast %26 : vector<16x1xf32> to vector<16x32xf32>
    %28 = arith.subf %0, %27 : vector<16x32xf32>
    %29 = arith.mulf %28, %28 : vector<16x32xf32>
    %cst_17 = arith.constant dense<0.000000e+00> : vector<16xf32>
    %30 = vector.multi_reduction <add>, %29, %cst_17 [1] : vector<16x32xf32> to vector<16xf32>
    %31 = vector.shape_cast %30 : vector<16xf32> to vector<16x1xf32>
    %cst_18 = arith.constant 3.200000e+01 : f32
    %32 = vector.broadcast %cst_18 : f32 to vector<16x1xf32>
    %33 = arith.divf %31, %32 : vector<16x1xf32>
    %cst_19 = arith.constant 9.99999974E-6 : f32
    %34 = vector.broadcast %cst_19 : f32 to vector<16x1xf32>
    %35 = arith.addf %33, %34 : vector<16x1xf32>
    %36 = math.rsqrt %35 : vector<16x1xf32>
    %37 = vector.broadcast %36 : vector<16x1xf32> to vector<16x32xf32>
    %38 = arith.mulf %28, %37 : vector<16x32xf32>
    %39 = vector.broadcast %10 : vector<1x32xf32> to vector<16x32xf32>
    %40 = arith.mulf %38, %39 : vector<16x32xf32>
    %41 = arith.truncf %40 : vector<16x32xf32> to vector<16x32xbf16>
    %cst_20 = arith.constant dense<0.000000e+00> : vector<16x96xf32>
    %42 = tpu.matmul %41, %1, %cst_20 {dimension_numbers = #tpu.dot_dimension_numbers<[1], [0], [0], [1], [0, 0, 1, 1], [], []>} : vector<16x32xbf16>, vector<32x96xbf16>, vector<16x96xf32> -> vector<16x96xf32>
    %43 = vector.extract_strided_slice %42 {offsets = [0, 0], sizes = [16, 8], strides = [1, 1]} : vector<16x96xf32> to vector<16x8xf32>
    %44 = arith.truncf %43 : vector<16x8xf32> to vector<16x8xbf16>
    %45 = vector.extract_strided_slice %42 {offsets = [0, 32], sizes = [16, 8], strides = [1, 1]} : vector<16x96xf32> to vector<16x8xf32>
    %46 = arith.truncf %45 : vector<16x8xf32> to vector<16x8xbf16>
    %47 = vector.extract_strided_slice %42 {offsets = [0, 64], sizes = [16, 8], strides = [1, 1]} : vector<16x96xf32> to vector<16x8xf32>
    %48 = arith.truncf %47 : vector<16x8xf32> to vector<16x8xbf16>
    %cst_21 = arith.constant dense<0.000000e+00> : vector<16x16xf32>
    %49 = tpu.matmul %44, %46, %cst_21 {dimension_numbers = #tpu.dot_dimension_numbers<[1], [1], [0], [0], [0, 0, 1, 0], [], []>} : vector<16x8xbf16>, vector<16x8xbf16>, vector<16x16xf32> -> vector<16x16xf32>
    %50 = arith.addf %49, %8 : vector<16x16xf32>
    %51 = math.exp %50 : vector<16x16xf32>
    %cst_22 = arith.constant dense<0.000000e+00> : vector<16xf32>
    %52 = vector.multi_reduction <add>, %51, %cst_22 [1] : vector<16x16xf32> to vector<16xf32>
    %53 = vector.shape_cast %52 : vector<16xf32> to vector<16x1xf32>
    %54 = tpu.reciprocal %53 : vector<16x1xf32> -> vector<16x1xf32>
    %55 = vector.broadcast %54 : vector<16x1xf32> to vector<16x16xf32>
    %56 = arith.mulf %51, %55 : vector<16x16xf32>
    %57 = arith.truncf %56 : vector<16x16xf32> to vector<16x16xbf16>
    %cst_23 = arith.constant dense<0.000000e+00> : vector<16x8xf32>
    %58 = tpu.matmul %57, %48, %cst_23 {dimension_numbers = #tpu.dot_dimension_numbers<[1], [0], [0], [1], [0, 0, 1, 1], [], []>} : vector<16x16xbf16>, vector<16x8xbf16>, vector<16x8xf32> -> vector<16x8xf32>
    %59 = vector.extract_strided_slice %42 {offsets = [0, 8], sizes = [16, 8], strides = [1, 1]} : vector<16x96xf32> to vector<16x8xf32>
    %60 = arith.truncf %59 : vector<16x8xf32> to vector<16x8xbf16>
    %61 = vector.extract_strided_slice %42 {offsets = [0, 40], sizes = [16, 8], strides = [1, 1]} : vector<16x96xf32> to vector<16x8xf32>
    %62 = arith.truncf %61 : vector<16x8xf32> to vector<16x8xbf16>
    %63 = vector.extract_strided_slice %42 {offsets = [0, 72], sizes = [16, 8], strides = [1, 1]} : vector<16x96xf32> to vector<16x8xf32>
    %64 = arith.truncf %63 : vector<16x8xf32> to vector<16x8xbf16>
    %cst_24 = arith.constant dense<0.000000e+00> : vector<16x16xf32>
    %65 = tpu.matmul %60, %62, %cst_24 {dimension_numbers = #tpu.dot_dimension_numbers<[1], [1], [0], [0], [0, 0, 1, 0], [], []>} : vector<16x8xbf16>, vector<16x8xbf16>, vector<16x16xf32> -> vector<16x16xf32>
    %66 = arith.addf %65, %8 : vector<16x16xf32>
    %67 = math.exp %66 : vector<16x16xf32>
    %cst_25 = arith.constant dense<0.000000e+00> : vector<16xf32>
    %68 = vector.multi_reduction <add>, %67, %cst_25 [1] : vector<16x16xf32> to vector<16xf32>
    %69 = vector.shape_cast %68 : vector<16xf32> to vector<16x1xf32>
    %70 = tpu.reciprocal %69 : vector<16x1xf32> -> vector<16x1xf32>
    %71 = vector.broadcast %70 : vector<16x1xf32> to vector<16x16xf32>
    %72 = arith.mulf %67, %71 : vector<16x16xf32>
    %73 = arith.truncf %72 : vector<16x16xf32> to vector<16x16xbf16>
    %cst_26 = arith.constant dense<0.000000e+00> : vector<16x8xf32>
    %74 = tpu.matmul %73, %64, %cst_26 {dimension_numbers = #tpu.dot_dimension_numbers<[1], [0], [0], [1], [0, 0, 1, 1], [], []>} : vector<16x16xbf16>, vector<16x8xbf16>, vector<16x8xf32> -> vector<16x8xf32>
    %75 = vector.extract_strided_slice %42 {offsets = [0, 16], sizes = [16, 8], strides = [1, 1]} : vector<16x96xf32> to vector<16x8xf32>
    %76 = arith.truncf %75 : vector<16x8xf32> to vector<16x8xbf16>
    %77 = vector.extract_strided_slice %42 {offsets = [0, 48], sizes = [16, 8], strides = [1, 1]} : vector<16x96xf32> to vector<16x8xf32>
    %78 = arith.truncf %77 : vector<16x8xf32> to vector<16x8xbf16>
    %79 = vector.extract_strided_slice %42 {offsets = [0, 80], sizes = [16, 8], strides = [1, 1]} : vector<16x96xf32> to vector<16x8xf32>
    %80 = arith.truncf %79 : vector<16x8xf32> to vector<16x8xbf16>
    %cst_27 = arith.constant dense<0.000000e+00> : vector<16x16xf32>
    %81 = tpu.matmul %76, %78, %cst_27 {dimension_numbers = #tpu.dot_dimension_numbers<[1], [1], [0], [0], [0, 0, 1, 0], [], []>} : vector<16x8xbf16>, vector<16x8xbf16>, vector<16x16xf32> -> vector<16x16xf32>
    %82 = arith.addf %81, %8 : vector<16x16xf32>
    %83 = math.exp %82 : vector<16x16xf32>
    %cst_28 = arith.constant dense<0.000000e+00> : vector<16xf32>
    %84 = vector.multi_reduction <add>, %83, %cst_28 [1] : vector<16x16xf32> to vector<16xf32>
    %85 = vector.shape_cast %84 : vector<16xf32> to vector<16x1xf32>
    %86 = tpu.reciprocal %85 : vector<16x1xf32> -> vector<16x1xf32>
    %87 = vector.broadcast %86 : vector<16x1xf32> to vector<16x16xf32>
    %88 = arith.mulf %83, %87 : vector<16x16xf32>
    %89 = arith.truncf %88 : vector<16x16xf32> to vector<16x16xbf16>
    %cst_29 = arith.constant dense<0.000000e+00> : vector<16x8xf32>
    %90 = tpu.matmul %89, %80, %cst_29 {dimension_numbers = #tpu.dot_dimension_numbers<[1], [0], [0], [1], [0, 0, 1, 1], [], []>} : vector<16x16xbf16>, vector<16x8xbf16>, vector<16x8xf32> -> vector<16x8xf32>
    %91 = vector.extract_strided_slice %42 {offsets = [0, 24], sizes = [16, 8], strides = [1, 1]} : vector<16x96xf32> to vector<16x8xf32>
    %92 = arith.truncf %91 : vector<16x8xf32> to vector<16x8xbf16>
    %93 = vector.extract_strided_slice %42 {offsets = [0, 56], sizes = [16, 8], strides = [1, 1]} : vector<16x96xf32> to vector<16x8xf32>
    %94 = arith.truncf %93 : vector<16x8xf32> to vector<16x8xbf16>
    %95 = vector.extract_strided_slice %42 {offsets = [0, 88], sizes = [16, 8], strides = [1, 1]} : vector<16x96xf32> to vector<16x8xf32>
    %96 = arith.truncf %95 : vector<16x8xf32> to vector<16x8xbf16>
    %cst_30 = arith.constant dense<0.000000e+00> : vector<16x16xf32>
    %97 = tpu.matmul %92, %94, %cst_30 {dimension_numbers = #tpu.dot_dimension_numbers<[1], [1], [0], [0], [0, 0, 1, 0], [], []>} : vector<16x8xbf16>, vector<16x8xbf16>, vector<16x16xf32> -> vector<16x16xf32>
    %98 = arith.addf %97, %8 : vector<16x16xf32>
    %99 = math.exp %98 : vector<16x16xf32>
    %cst_31 = arith.constant dense<0.000000e+00> : vector<16xf32>
    %100 = vector.multi_reduction <add>, %99, %cst_31 [1] : vector<16x16xf32> to vector<16xf32>
    %101 = vector.shape_cast %100 : vector<16xf32> to vector<16x1xf32>
    %102 = tpu.reciprocal %101 : vector<16x1xf32> -> vector<16x1xf32>
    %103 = vector.broadcast %102 : vector<16x1xf32> to vector<16x16xf32>
    %104 = arith.mulf %99, %103 : vector<16x16xf32>
    %105 = arith.truncf %104 : vector<16x16xf32> to vector<16x16xbf16>
    %cst_32 = arith.constant dense<0.000000e+00> : vector<16x8xf32>
    %106 = tpu.matmul %105, %96, %cst_32 {dimension_numbers = #tpu.dot_dimension_numbers<[1], [0], [0], [1], [0, 0, 1, 1], [], []>} : vector<16x16xbf16>, vector<16x8xbf16>, vector<16x8xf32> -> vector<16x8xf32>
    %107 = tpu.concatenate %58, %74, %90, %106 in 1 : vector<16x8xf32>, vector<16x8xf32>, vector<16x8xf32>, vector<16x8xf32> -> vector<16x32xf32>
    %108 = arith.truncf %107 : vector<16x32xf32> to vector<16x32xbf16>
    %cst_33 = arith.constant dense<0.000000e+00> : vector<16x32xf32>
    %109 = tpu.matmul %108, %5, %cst_33 {dimension_numbers = #tpu.dot_dimension_numbers<[1], [0], [0], [1], [0, 0, 1, 1], [], []>} : vector<16x32xbf16>, vector<32x32xbf16>, vector<16x32xf32> -> vector<16x32xf32>
    %110 = vector.broadcast %16 : vector<1x32xf32> to vector<16x32xf32>
    %111 = arith.addf %109, %110 : vector<16x32xf32>
    %112 = arith.addf %0, %111 : vector<16x32xf32>
    %cst_34 = arith.constant dense<0.000000e+00> : vector<16xf32>
    %113 = vector.multi_reduction <add>, %112, %cst_34 [1] : vector<16x32xf32> to vector<16xf32>
    %114 = vector.shape_cast %113 : vector<16xf32> to vector<16x1xf32>
    %cst_35 = arith.constant 3.200000e+01 : f32
    %115 = vector.broadcast %cst_35 : f32 to vector<16x1xf32>
    %116 = arith.divf %114, %115 : vector<16x1xf32>
    %117 = vector.broadcast %116 : vector<16x1xf32> to vector<16x32xf32>
    %118 = arith.subf %112, %117 : vector<16x32xf32>
    %119 = arith.mulf %118, %118 : vector<16x32xf32>
    %cst_36 = arith.constant dense<0.000000e+00> : vector<16xf32>
    %120 = vector.multi_reduction <add>, %119, %cst_36 [1] : vector<16x32xf32> to vector<16xf32>
    %121 = vector.shape_cast %120 : vector<16xf32> to vector<16x1xf32>
    %cst_37 = arith.constant 3.200000e+01 : f32
    %122 = vector.broadcast %cst_37 : f32 to vector<16x1xf32>
    %123 = arith.divf %121, %122 : vector<16x1xf32>
    %cst_38 = arith.constant 9.99999974E-6 : f32
    %124 = vector.broadcast %cst_38 : f32 to vector<16x1xf32>
    %125 = arith.addf %123, %124 : vector<16x1xf32>
    %126 = math.rsqrt %125 : vector<16x1xf32>
    %127 = vector.broadcast %126 : vector<16x1xf32> to vector<16x32xf32>
    %128 = arith.mulf %118, %127 : vector<16x32xf32>
    %129 = vector.broadcast %12 : vector<1x32xf32> to vector<16x32xf32>
    %130 = arith.mulf %128, %129 : vector<16x32xf32>
    %131 = arith.truncf %130 : vector<16x32xf32> to vector<16x32xbf16>
    %cst_39 = arith.constant dense<0.000000e+00> : vector<16x96xf32>
    %132 = tpu.matmul %131, %2, %cst_39 {dimension_numbers = #tpu.dot_dimension_numbers<[1], [0], [0], [1], [0, 0, 1, 1], [], []>} : vector<16x32xbf16>, vector<32x96xbf16>, vector<16x96xf32> -> vector<16x96xf32>
    %133 = vector.extract_strided_slice %132 {offsets = [0, 0], sizes = [16, 8], strides = [1, 1]} : vector<16x96xf32> to vector<16x8xf32>
    %134 = arith.truncf %133 : vector<16x8xf32> to vector<16x8xbf16>
    %135 = vector.extract_strided_slice %132 {offsets = [0, 32], sizes = [16, 8], strides = [1, 1]} : vector<16x96xf32> to vector<16x8xf32>
    %136 = arith.truncf %135 : vector<16x8xf32> to vector<16x8xbf16>
    %137 = vector.extract_strided_slice %132 {offsets = [0, 64], sizes = [16, 8], strides = [1, 1]} : vector<16x96xf32> to vector<16x8xf32>
    %138 = arith.truncf %137 : vector<16x8xf32> to vector<16x8xbf16>
    %cst_40 = arith.constant dense<0.000000e+00> : vector<16x16xf32>
    %139 = tpu.matmul %134, %136, %cst_40 {dimension_numbers = #tpu.dot_dimension_numbers<[1], [1], [0], [0], [0, 0, 1, 0], [], []>} : vector<16x8xbf16>, vector<16x8xbf16>, vector<16x16xf32> -> vector<16x16xf32>
    %140 = arith.addf %139, %8 : vector<16x16xf32>
    %141 = math.exp %140 : vector<16x16xf32>
    %cst_41 = arith.constant dense<0.000000e+00> : vector<16xf32>
    %142 = vector.multi_reduction <add>, %141, %cst_41 [1] : vector<16x16xf32> to vector<16xf32>
    %143 = vector.shape_cast %142 : vector<16xf32> to vector<16x1xf32>
    %144 = tpu.reciprocal %143 : vector<16x1xf32> -> vector<16x1xf32>
    %145 = vector.broadcast %144 : vector<16x1xf32> to vector<16x16xf32>
    %146 = arith.mulf %141, %145 : vector<16x16xf32>
    %147 = arith.truncf %146 : vector<16x16xf32> to vector<16x16xbf16>
    %cst_42 = arith.constant dense<0.000000e+00> : vector<16x8xf32>
    %148 = tpu.matmul %147, %138, %cst_42 {dimension_numbers = #tpu.dot_dimension_numbers<[1], [0], [0], [1], [0, 0, 1, 1], [], []>} : vector<16x16xbf16>, vector<16x8xbf16>, vector<16x8xf32> -> vector<16x8xf32>
    %149 = vector.extract_strided_slice %132 {offsets = [0, 8], sizes = [16, 8], strides = [1, 1]} : vector<16x96xf32> to vector<16x8xf32>
    %150 = arith.truncf %149 : vector<16x8xf32> to vector<16x8xbf16>
    %151 = vector.extract_strided_slice %132 {offsets = [0, 40], sizes = [16, 8], strides = [1, 1]} : vector<16x96xf32> to vector<16x8xf32>
    %152 = arith.truncf %151 : vector<16x8xf32> to vector<16x8xbf16>
    %153 = vector.extract_strided_slice %132 {offsets = [0, 72], sizes = [16, 8], strides = [1, 1]} : vector<16x96xf32> to vector<16x8xf32>
    %154 = arith.truncf %153 : vector<16x8xf32> to vector<16x8xbf16>
    %cst_43 = arith.constant dense<0.000000e+00> : vector<16x16xf32>
    %155 = tpu.matmul %150, %152, %cst_43 {dimension_numbers = #tpu.dot_dimension_numbers<[1], [1], [0], [0], [0, 0, 1, 0], [], []>} : vector<16x8xbf16>, vector<16x8xbf16>, vector<16x16xf32> -> vector<16x16xf32>
    %156 = arith.addf %155, %8 : vector<16x16xf32>
    %157 = math.exp %156 : vector<16x16xf32>
    %cst_44 = arith.constant dense<0.000000e+00> : vector<16xf32>
    %158 = vector.multi_reduction <add>, %157, %cst_44 [1] : vector<16x16xf32> to vector<16xf32>
    %159 = vector.shape_cast %158 : vector<16xf32> to vector<16x1xf32>
    %160 = tpu.reciprocal %159 : vector<16x1xf32> -> vector<16x1xf32>
    %161 = vector.broadcast %160 : vector<16x1xf32> to vector<16x16xf32>
    %162 = arith.mulf %157, %161 : vector<16x16xf32>
    %163 = arith.truncf %162 : vector<16x16xf32> to vector<16x16xbf16>
    %cst_45 = arith.constant dense<0.000000e+00> : vector<16x8xf32>
    %164 = tpu.matmul %163, %154, %cst_45 {dimension_numbers = #tpu.dot_dimension_numbers<[1], [0], [0], [1], [0, 0, 1, 1], [], []>} : vector<16x16xbf16>, vector<16x8xbf16>, vector<16x8xf32> -> vector<16x8xf32>
    %165 = vector.extract_strided_slice %132 {offsets = [0, 16], sizes = [16, 8], strides = [1, 1]} : vector<16x96xf32> to vector<16x8xf32>
    %166 = arith.truncf %165 : vector<16x8xf32> to vector<16x8xbf16>
    %167 = vector.extract_strided_slice %132 {offsets = [0, 48], sizes = [16, 8], strides = [1, 1]} : vector<16x96xf32> to vector<16x8xf32>
    %168 = arith.truncf %167 : vector<16x8xf32> to vector<16x8xbf16>
    %169 = vector.extract_strided_slice %132 {offsets = [0, 80], sizes = [16, 8], strides = [1, 1]} : vector<16x96xf32> to vector<16x8xf32>
    %170 = arith.truncf %169 : vector<16x8xf32> to vector<16x8xbf16>
    %cst_46 = arith.constant dense<0.000000e+00> : vector<16x16xf32>
    %171 = tpu.matmul %166, %168, %cst_46 {dimension_numbers = #tpu.dot_dimension_numbers<[1], [1], [0], [0], [0, 0, 1, 0], [], []>} : vector<16x8xbf16>, vector<16x8xbf16>, vector<16x16xf32> -> vector<16x16xf32>
    %172 = arith.addf %171, %8 : vector<16x16xf32>
    %173 = math.exp %172 : vector<16x16xf32>
    %cst_47 = arith.constant dense<0.000000e+00> : vector<16xf32>
    %174 = vector.multi_reduction <add>, %173, %cst_47 [1] : vector<16x16xf32> to vector<16xf32>
    %175 = vector.shape_cast %174 : vector<16xf32> to vector<16x1xf32>
    %176 = tpu.reciprocal %175 : vector<16x1xf32> -> vector<16x1xf32>
    %177 = vector.broadcast %176 : vector<16x1xf32> to vector<16x16xf32>
    %178 = arith.mulf %173, %177 : vector<16x16xf32>
    %179 = arith.truncf %178 : vector<16x16xf32> to vector<16x16xbf16>
    %cst_48 = arith.constant dense<0.000000e+00> : vector<16x8xf32>
    %180 = tpu.matmul %179, %170, %cst_48 {dimension_numbers = #tpu.dot_dimension_numbers<[1], [0], [0], [1], [0, 0, 1, 1], [], []>} : vector<16x16xbf16>, vector<16x8xbf16>, vector<16x8xf32> -> vector<16x8xf32>
    %181 = vector.extract_strided_slice %132 {offsets = [0, 24], sizes = [16, 8], strides = [1, 1]} : vector<16x96xf32> to vector<16x8xf32>
    %182 = arith.truncf %181 : vector<16x8xf32> to vector<16x8xbf16>
    %183 = vector.extract_strided_slice %132 {offsets = [0, 56], sizes = [16, 8], strides = [1, 1]} : vector<16x96xf32> to vector<16x8xf32>
    %184 = arith.truncf %183 : vector<16x8xf32> to vector<16x8xbf16>
    %185 = vector.extract_strided_slice %132 {offsets = [0, 88], sizes = [16, 8], strides = [1, 1]} : vector<16x96xf32> to vector<16x8xf32>
    %186 = arith.truncf %185 : vector<16x8xf32> to vector<16x8xbf16>
    %cst_49 = arith.constant dense<0.000000e+00> : vector<16x16xf32>
    %187 = tpu.matmul %182, %184, %cst_49 {dimension_numbers = #tpu.dot_dimension_numbers<[1], [1], [0], [0], [0, 0, 1, 0], [], []>} : vector<16x8xbf16>, vector<16x8xbf16>, vector<16x16xf32> -> vector<16x16xf32>
    %188 = arith.addf %187, %8 : vector<16x16xf32>
    %189 = math.exp %188 : vector<16x16xf32>
    %cst_50 = arith.constant dense<0.000000e+00> : vector<16xf32>
    %190 = vector.multi_reduction <add>, %189, %cst_50 [1] : vector<16x16xf32> to vector<16xf32>
    %191 = vector.shape_cast %190 : vector<16xf32> to vector<16x1xf32>
    %192 = tpu.reciprocal %191 : vector<16x1xf32> -> vector<16x1xf32>
    %193 = vector.broadcast %192 : vector<16x1xf32> to vector<16x16xf32>
    %194 = arith.mulf %189, %193 : vector<16x16xf32>
    %195 = arith.truncf %194 : vector<16x16xf32> to vector<16x16xbf16>
    %cst_51 = arith.constant dense<0.000000e+00> : vector<16x8xf32>
    %196 = tpu.matmul %195, %186, %cst_51 {dimension_numbers = #tpu.dot_dimension_numbers<[1], [0], [0], [1], [0, 0, 1, 1], [], []>} : vector<16x16xbf16>, vector<16x8xbf16>, vector<16x8xf32> -> vector<16x8xf32>
    %197 = tpu.concatenate %148, %164, %180, %196 in 1 : vector<16x8xf32>, vector<16x8xf32>, vector<16x8xf32>, vector<16x8xf32> -> vector<16x32xf32>
    %198 = arith.truncf %197 : vector<16x32xf32> to vector<16x32xbf16>
    %cst_52 = arith.constant dense<0.000000e+00> : vector<16x32xf32>
    %199 = tpu.matmul %198, %6, %cst_52 {dimension_numbers = #tpu.dot_dimension_numbers<[1], [0], [0], [1], [0, 0, 1, 1], [], []>} : vector<16x32xbf16>, vector<32x32xbf16>, vector<16x32xf32> -> vector<16x32xf32>
    %200 = vector.broadcast %18 : vector<1x32xf32> to vector<16x32xf32>
    %201 = arith.addf %199, %200 : vector<16x32xf32>
    %202 = arith.addf %112, %201 : vector<16x32xf32>
    %cst_53 = arith.constant dense<0.000000e+00> : vector<16xf32>
    %203 = vector.multi_reduction <add>, %202, %cst_53 [1] : vector<16x32xf32> to vector<16xf32>
    %204 = vector.shape_cast %203 : vector<16xf32> to vector<16x1xf32>
    %cst_54 = arith.constant 3.200000e+01 : f32
    %205 = vector.broadcast %cst_54 : f32 to vector<16x1xf32>
    %206 = arith.divf %204, %205 : vector<16x1xf32>
    %207 = vector.broadcast %206 : vector<16x1xf32> to vector<16x32xf32>
    %208 = arith.subf %202, %207 : vector<16x32xf32>
    %209 = arith.mulf %208, %208 : vector<16x32xf32>
    %cst_55 = arith.constant dense<0.000000e+00> : vector<16xf32>
    %210 = vector.multi_reduction <add>, %209, %cst_55 [1] : vector<16x32xf32> to vector<16xf32>
    %211 = vector.shape_cast %210 : vector<16xf32> to vector<16x1xf32>
    %cst_56 = arith.constant 3.200000e+01 : f32
    %212 = vector.broadcast %cst_56 : f32 to vector<16x1xf32>
    %213 = arith.divf %211, %212 : vector<16x1xf32>
    %cst_57 = arith.constant 9.99999974E-6 : f32
    %214 = vector.broadcast %cst_57 : f32 to vector<16x1xf32>
    %215 = arith.addf %213, %214 : vector<16x1xf32>
    %216 = math.rsqrt %215 : vector<16x1xf32>
    %217 = vector.broadcast %216 : vector<16x1xf32> to vector<16x32xf32>
    %218 = arith.mulf %208, %217 : vector<16x32xf32>
    %219 = vector.broadcast %14 : vector<1x32xf32> to vector<16x32xf32>
    %220 = arith.mulf %218, %219 : vector<16x32xf32>
    %221 = arith.truncf %220 : vector<16x32xf32> to vector<16x32xbf16>
    %cst_58 = arith.constant dense<0.000000e+00> : vector<16x64xf32>
    %222 = tpu.matmul %221, %3, %cst_58 {dimension_numbers = #tpu.dot_dimension_numbers<[1], [0], [0], [1], [0, 0, 1, 1], [], []>} : vector<16x32xbf16>, vector<32x64xbf16>, vector<16x64xf32> -> vector<16x64xf32>
    %223 = vector.broadcast %20 : vector<1x64xf32> to vector<16x64xf32>
    %224 = arith.addf %222, %223 : vector<16x64xf32>
    %cst_59 = arith.constant 0.000000e+00 : f32
    %225 = vector.broadcast %cst_59 : f32 to vector<16x64xf32>
    %226 = arith.maximumf %224, %225 : vector<16x64xf32>
    %227 = arith.truncf %226 : vector<16x64xf32> to vector<16x64xbf16>
    %cst_60 = arith.constant dense<0.000000e+00> : vector<16x32xf32>
    %228 = tpu.matmul %227, %4, %cst_60 {dimension_numbers = #tpu.dot_dimension_numbers<[1], [0], [0], [1], [0, 0, 1, 1], [], []>} : vector<16x64xbf16>, vector<64x32xbf16>, vector<16x32xf32> -> vector<16x32xf32>
    %229 = vector.broadcast %22 : vector<1x32xf32> to vector<16x32xf32>
    %230 = arith.addf %228, %229 : vector<16x32xf32>
    %231 = arith.addf %202, %220 : vector<16x32xf32>
    %232 = arith.addf %231, %230 : vector<16x32xf32>
    %c0_61 = arith.constant 0 : index
    %c0_62 = arith.constant 0 : index
    %233 = vector.load %arg2[%c0_61, %c0_62] : memref<16x32xf32, #tpu.memory_space<vmem>>, vector<16x32xf32>
    tpu.vector_store %arg2[%c0_61, %c0_62], %232 {strides = array<i32>} : memref<16x32xf32, #tpu.memory_space<vmem>>, vector<16x32xf32>,
    return
  }
}

</mosaic_0001>

<bundles_post_ra>
// kernel: tpu_custom_call.1
= control target key start
LH: loop header
LB: loop body
LE: loop exit
PB: predicated region body
PF: predicated region fallthrough
CT: control target
= control target key end

     0   :  { %7 = vsyncpa [#allocation3], 0  ;;  %s2360_s0 = inlined_call_operand.hbm [shape: f32[16,32], index: 0, kind: input, shape index: {}]   ;;  %s2361_s1 = inlined_call_operand.hbm [shape: bf16[256,128], index: 1, kind: input, shape index: {}]   ;;  %s2362_s2 = inlined_call_operand.hbm [shape: f32[16,32], index: 2, kind: output, shape index: {}]  }
   0x1   :  { %8 = vsyncpa [#allocation6], 0 }
   0x2   :  { %9 = vsyncpa [#allocation4], 0  ;;  %s2003_s9 = smov [#allocation2]   ;;  %s1931_s13 = scalar_lea.hbm %s2360_s0, 256 }
   0x3   :  { %s15_s10 = sshll.u32 %s2003_s9, 4  ;;  %p1932_p0 = scmp.ne.s32.totalorder %s2360_s0, %s1931_s13  ;;  %s16_s10 = int_to_ptr.vmem [resolvable:$true] %s15_s10 }
   0x4   :  { %p1935_p1 = scmp.lt.u32.totalorder %s1931_s13, %s2360_s0 }
   0x6   :  { %p1937_p2 = pnand %p1935_p1, %p1932_p0 }
   0x8   :  { %1940 = shalt.err (!%p1937_p2)
}
   0x9   :  { %s1941_s18 = scalar_lea.vmem %s16_s10, 256  ;;  %p1946_p4 = scmp.lt.s32.totalorder %s16_s10, %s16_s10 }
   0xa   :  { %p1942_p3 = scmp.ne.s32.totalorder %s16_s10, %s1941_s18  ;;  %p1947_p5 = scmp.lt.s32.totalorder %s1941_s18, %s1941_s18 }
   0xc   :  { %p1948_p6 = por %p1947_p5, %p1946_p4 }
   0xe   :  { %p1949_p7 = pnand %p1948_p6, %p1942_p3 }
  0x10   :  { %1952 = shalt.err (!%p1949_p7)
}
  0x11   :  { %s2004_s19 = smov 128   ;;  %s2005_s20 = smov 8  }
  0x12   :  { %21 = dma.hbm_to_vmem [thread:$0]  %s2360_s0, 256, %s16_s10, [#allocation3], %s2004_s19, %s2004_s19, %s2005_s20  }
  0x13   :  { %s2006_s23 = smov [#allocation5]   ;;  %s1953_s27 = scalar_lea.hbm %s2361_s1, 2048 }
  0x14   :  { %s27_s24 = sshll.u32 %s2006_s23, 4  ;;  %p1954_p8 = scmp.ne.s32.totalorder %s2361_s1, %s1953_s27  ;;  %s28_s24 = int_to_ptr.vmem [resolvable:$true] %s27_s24 }
  0x15   :  { %p1957_p9 = scmp.lt.u32.totalorder %s1953_s27, %s2361_s1 }
  0x17   :  { %p1959_p10 = pnand %p1957_p9, %p1954_p8 }
  0x19   :  { %1962 = shalt.err (!%p1959_p10)
}
  0x1a   :  { %s1963_s4 = scalar_lea.vmem %s28_s24, 2048  ;;  %p1968_p12 = scmp.lt.s32.totalorder %s28_s24, %s28_s24 }
  0x1b   :  { %p1964_p11 = scmp.ne.s32.totalorder %s28_s24, %s1963_s4  ;;  %p1969_p13 = scmp.lt.s32.totalorder %s1963_s4, %s1963_s4 }
  0x1d   :  { %p1970_p0 = por %p1969_p13, %p1968_p12 }
  0x1f   :  { %p1971_p1 = pnand %p1970_p0, %p1964_p11 }
  0x21   :  { %1974 = shalt.err (!%p1971_p1)
}
  0x22   :  { %s2007_s0 = smov 64   ;;  %s2008_s5 = smov 4  }
  0x23   :  { %33 = dma.hbm_to_vmem [thread:$0]  %s2361_s1, 2048, %s28_s24, [#allocation6], %s2007_s0, %s2007_s0, %s2008_s5  }
  0x24   :  { %1997 = dma.done.wait [#allocation3], 256  }
  0x25   :  { %1998 = vsyncadd [#allocation3], 4294967040 }
  0x26   :  { %1999 = dma.done.wait [#allocation6], 2048  }
  0x27   :  { %2000 = vsyncadd [#allocation6], 4294965248  ;;  %vm83_vm0 = vcmask 261120   ;;  %v2068_v0 = vld [vmem:[#allocation2] sm:$0xff]  ;;  %v2070_v1 = vld [vmem:[#allocation2 + $0x8] sm:$0xff]  ;;  %v2009_v15 = vmov 0.0   ;;  %v111_v22 = vlaneseq }
  0x28   :  { %v84_v2 = vsel %vm83_vm0, %v2068_v0, 0.0  ;;  %v87_v3 = vsel %vm83_vm0, %v2070_v1, 0.0  ;;  %v1841_v14 = vld [vmem:[#allocation5] sm:$0xff]   ;;  %1642 = vmatprep.subr.bf16.mxu0 %v2009_v15  ;;  %vm2010_vm1 = vmmov 0   ;;  %v1842_v16 = vld [vmem:[#allocation5 + $0x8] sm:$0xff]   ;;  %1650 = vmatprep.subr.bf16.mxu1 %v2009_v15  ;;  %s2011_s1 = smov 88  }
  0x29   :  { %85 = vadd.xlane.f32.xlu0 %v84_v2  ;;  %1646 = vmatprep.mubr.msk.bf16.mxu0 %vm2010_vm1, %v2009_v15  ;;  %v2088_v24 = vshrl.u32 %v111_v22, 7  ;;  %v2090_v25 = vld [vmem:[#allocation5 + $0x78] sm:$0x1]  ;;  %s2012_s8 = smov 96   ;;  %s2013_s9 = smov 120   ;;  %vm178_vm2 = vcmask 64512  }
  0x2a   :  { %1643 = vmatpush3.bf16.msra.mxu0 %v1841_v14  ;;  %1652 = vmatprep.mubr.msk.bf16.mxu1 %vm2010_vm1, %v2009_v15  ;;  %v76_v26 = vunpack.c.l.bf16 %v2090_v25  ;;  %s2014_s10 = smov 112   ;;  %s2015_s11 = smov 80   ;;  %v1589_v53 = vld [vmem:[#allocation5 + $0x70] sm:$0xff]   ;;  %vm230_vm3 = vcmask 130048   ;;  %vm656_vm4 = vcmask 195584   ;;  %vm1480_vm5 = vcmask 523264  }
  0x2b   :  { %1644 = vmatprep.subr.bf16.mxu0 %v2009_v15  ;;  %v113_v27 = vsub.s32 0, %v2088_v24  ;;  %s2016_s12 = smov 104   ;;  %s2017_s13 = smov 72   ;;  %v2139_v54 = vunpack.c.l.bf16 %v1589_v53  ;;  %v2141_v55 = vunpack.c.h.bf16 %v1589_v53 }
  0x2c   :  { %s2018_s14 = smov 48   ;;  %s2019_s15 = smov 40  }
  0x2d   :  { %88 = vadd.xlane.f32.xlu0 %v87_v3  ;;  %v114_v30 = vrot.slane %v76_v26, %v113_v27  ;;  %s2020_s16 = smov 56   ;;  %s2021_s17 = smov 16  }
  0x2e   :  { %1645 = vmatpush3.bf16.msra.mxu0 %v1842_v16  ;;  %s2022_s18 = smov 24   ;;  %s2023_s21 = smov [#allocation7]  }
  0x2f   :  { %1656 = vmatprep.subr.bf16.mxu0 %v2009_v15  ;;  %s1536_s22 = sshll.u32 %s2023_s21, 4  ;;  %s1537_s22 = int_to_ptr.vmem [resolvable:$true] %s1536_s22 }
  0x30   :  { %s1975_s23 = scalar_lea.vmem %s1537_s22, 256  ;;  %p1980_p3 = scmp.lt.s32.totalorder %s1537_s22, %s1537_s22 }
  0x31   :  { %p1976_p2 = scmp.ne.s32.totalorder %s1537_s22, %s1975_s23  ;;  %p1981_p4 = scmp.lt.s32.totalorder %s1975_s23, %s1975_s23 }
  0x33   :  { %p1982_p5 = por %p1981_p4, %p1980_p3 }
  0x35   :  { %p1983_p6 = pnand %p1982_p5, %p1976_p2 }
  0xb6   :  { %v86_v4 = vpop.xlane.xlu0 %85 }
  0xb7   :  { %v91_v5 = vmul.f32 0.03125, %v86_v4 }
  0xb9   :  { %v93_v6 = vsub.f32 %v2068_v0, %v91_v5 }
  0xba   :  { %v89_v7 = vpop.xlane.xlu0 %88 }
  0xbb   :  { %v92_v8 = vmul.f32 0.03125, %v89_v7  ;;  %v95_v9 = vmul.f32 %v93_v6, %v93_v6 }
  0xbd   :  { %v94_v10 = vsub.f32 %v2070_v1, %v92_v8  ;;  %v97_v11 = vsel %vm83_vm0, %v95_v9, 0.0 }
  0xbe   :  { %98 = vadd.xlane.f32.xlu1 %v97_v11 }
  0xbf   :  { %v96_v12 = vmul.f32 %v94_v10, %v94_v10 }
  0xc1   :  { %v100_v13 = vsel %vm83_vm0, %v96_v12, 0.0 }
  0xc2   :  { %101 = vadd.xlane.f32.xlu1 %v100_v13 }
 0x14b   :  { %v99_v17 = vpop.xlane.xlu1 %98 }
 0x14c   :  { %v103_v18 = vmul.f32 0.03125, %v99_v17 }
 0x14e   :  { %v105_v19 = vadd.f32 1e-05, %v103_v18 }
 0x14f   :  { %v102_v20 = vpop.xlane.xlu1 %101 }
 0x150   :  { %1855 = vrsqrt.f32 %v105_v19  ;;  %v104_v21 = vmul.f32 0.03125, %v102_v20 }
 0x152   :  { %v106_v23 = vadd.f32 1e-05, %v104_v21 }
 0x154   :  { %1857 = vrsqrt.f32 %v106_v23 }
 0x15a   :  { %v1856_v28 = vpop.eup %1855 }
 0x15b   :  { %v109_v29 = vmul.f32 %v1856_v28, %v93_v6 }
 0x15d   :  { %v115_v33 = vmul.f32 %v114_v30, %v109_v29 }
 0x15e   :  { %v1858_v31 = vpop.eup %1857 }
 0x15f   :  { %v110_v32 = vmul.f32 %v1858_v31, %v94_v10 }
 0x161   :  { %v116_v34 = vmul.f32 %v114_v30, %v110_v32 }
 0x163   :  { %v117_v35 = vpack.c.bf16 %v116_v34, %v115_v33 }
 0x165   :  { %1647 = vmatmul.mubr.msk.bf16.vlgmr.msra.gmra.mrb[0].mxu0 %vm83_vm0, %v117_v35 }
 0x166   :  { %1658 = vmatprep.mubr.msk.bf16.mxu0 %vm2010_vm1, %v2009_v15 }
 0x238   :  { %v167_v36 = vpop.f32.mrb[0].mxu0 }
 0x239   :  { %v1648_v37 = vpop.f32.mrb[1].mxu0 }
 0x23a   :  { %v170_v38 = vpop.f32.mrb[2].mxu0 }
 0x23b   :  { %v2099_v39 = vpack.c.bf16 %v170_v38, %v167_v36  ;;  %v1649_v40 = vpop.f32.mrb[3].mxu0 }
 0x23d   :  { %291 = vrot.lane.b32.xlu1 %v2099_v39, %s2011_s1  ;;  %176 = vrot.lane.b32.xlu0 %v2099_v39, %s2012_s8 }
 0x241   :  { %289 = vrot.lane.b32.xlu1 %v2099_v39, %s2013_s9  ;;  %402 = vrot.lane.b32.xlu0 %v2099_v39, %s2014_s10 }
 0x245   :  { %404 = vrot.lane.b32.xlu1 %v2099_v39, %s2015_s11  ;;  %515 = vrot.lane.b32.xlu0 %v2099_v39, %s2016_s12 }
 0x249   :  { %517 = vrot.lane.b32.xlu1 %v2099_v39, %s2017_s13 }
 0x24d   :  { %242 = vrot.lane.b32.xlu1 %v2099_v39, %s2007_s0 }
 0x2af   :  { %v292_v41 = vpop.permute.xlu1 %291  ;;  %v177_v42 = vpop.permute.xlu0 %176 }
 0x2b0   :  { %v183_v43 = vsel %vm178_vm2, %v177_v42, 0  ;;  %v297_v46 = vsel %vm178_vm2, %v292_v41, 0 }
 0x2b1   :  { %1651 = vmatpush3.bf16.xpose.msra.mxu1 %v183_v43 }
 0x2b2   :  { %1662 = vmatprep.subr.bf16.mxu1 %v2009_v15 }
 0x2b3   :  { %v290_v44 = vpop.permute.xlu1 %289  ;;  %v403_v50 = vpop.permute.xlu0 %402 }
 0x2b7   :  { %v405_v45 = vpop.permute.xlu1 %404  ;;  %v516_v52 = vpop.permute.xlu0 %515 }
 0x2b8   :  { %1653 = vmatmul.mubr.msk.bf16.vlgmr.msra.gmra.mrb[0].mxu1 %vm178_vm2, %v2099_v39  ;;  %v410_v49 = vsel %vm178_vm2, %v405_v45, 0 }
 0x2b9   :  { %1663 = vmatpush3.bf16.xpose.msra.mxu1 %v297_v46  ;;  %1664 = vmatprep.mubr.msk.bf16.mxu1 %vm2010_vm1, %v2009_v15 }
 0x2ba   :  { %1674 = vmatprep.subr.bf16.mxu1 %v2009_v15 }
 0x2bb   :  { %v518_v47 = vpop.permute.xlu1 %517 }
 0x2bc   :  { %v523_v51 = vsel %vm178_vm2, %v518_v47, 0 }
 0x2bf   :  { %v243_v48 = vpop.permute.xlu1 %242 }
 0x2c0   :  { %1657 = vmatpush3.bf16.msra.mxu0 %v243_v48  ;;  %1665 = vmatmul.mubr.msk.bf16.vlgmr.msra.gmra.mrb[4].mxu1 %vm178_vm2, %v290_v44 }
 0x2c1   :  { %1675 = vmatpush3.bf16.xpose.msra.mxu1 %v410_v49  ;;  %1676 = vmatprep.mubr.msk.bf16.mxu1 %vm2010_vm1, %v2009_v15 }
 0x2c2   :  { %1686 = vmatprep.subr.bf16.mxu1 %v2009_v15  ;;  %1668 = vmatprep.subr.bf16.mxu0 %v2009_v15 }
 0x2c8   :  { %1677 = vmatmul.mubr.msk.bf16.vlgmr.msra.gmra.mrb[8].mxu1 %vm178_vm2, %v403_v50 }
 0x2c9   :  { %1687 = vmatpush3.bf16.xpose.msra.mxu1 %v523_v51  ;;  %1688 = vmatprep.mubr.msk.bf16.mxu1 %vm2010_vm1, %v2009_v15 }
 0x2ca   :  { %1698 = vmatprep.subr.bf16.mxu1 %v2009_v15 }
 0x2d0   :  { %1689 = vmatmul.mubr.msk.bf16.vlgmr.msra.gmra.mrb[12].mxu1 %vm178_vm2, %v516_v52 }
 0x2d1   :  { %1702 = vmatprep.mubr.msk.bf16.mxu1 %vm2010_vm1, %v2009_v15 }
 0x38b   :  { %v219_v56 = vpop.f32.mrb[0].mxu1 }
 0x38c   :  { %v220_v57 = vadd.f32 %v2139_v54, %v219_v56  ;;  %v1654_v58 = vpop.f32.mrb[1].mxu1 }
 0x38d   :  { %v222_v59 = vpop.f32.mrb[2].mxu1 }
 0x38e   :  { %v226_v60 = vmul.f32 1.442695, %v220_v57  ;;  %v223_v61 = vadd.f32 %v2141_v55, %v222_v59  ;;  %v1655_v62 = vpop.f32.mrb[3].mxu1 }
 0x390   :  { %1859 = vpow2.f32 %v226_v60  ;;  %v228_v63 = vmul.f32 1.442695, %v223_v61 }
 0x392   :  { %1861 = vpow2.f32 %v228_v63 }
 0x393   :  { %v333_v2 = vpop.f32.mrb[4].mxu1 }
 0x394   :  { %v334_v3 = vadd.f32 %v2139_v54, %v333_v2  ;;  %v1666_v4 = vpop.f32.mrb[5].mxu1 }
 0x395   :  { %v336_v5 = vpop.f32.mrb[6].mxu1 }
 0x396   :  { %v340_v6 = vmul.f32 1.442695, %v334_v3  ;;  %v337_v7 = vadd.f32 %v2141_v55, %v336_v5  ;;  %v1667_v8 = vpop.f32.mrb[7].mxu1 }
 0x398   :  { %1863 = vpow2.f32 %v340_v6  ;;  %v342_v9 = vmul.f32 1.442695, %v337_v7 }
 0x39a   :  { %v1860_v10 = vpop.eup %1859  ;;  %1865 = vpow2.f32 %v342_v9 }
 0x39b   :  { %v446_v11 = vpop.f32.mrb[8].mxu1  ;;  %v231_v12 = vsel %vm230_vm3, %v1860_v10, 0.0 }
 0x39c   :  { %v1862_v13 = vpop.eup %1861  ;;  %v447_v14 = vadd.f32 %v2139_v54, %v446_v11  ;;  %232 = vadd.xlane.f32.xlu1 %v231_v12  ;;  %v1678_v16 = vpop.f32.mrb[9].mxu1 }
 0x39d   :  { %v449_v17 = vpop.f32.mrb[10].mxu1  ;;  %v234_v18 = vsel %vm230_vm3, %v1862_v13, 0.0 }
 0x39e   :  { %v453_v19 = vmul.f32 1.442695, %v447_v14  ;;  %v450_v20 = vadd.f32 %v2141_v55, %v449_v17  ;;  %235 = vadd.xlane.f32.xlu0 %v234_v18  ;;  %v1679_v21 = vpop.f32.mrb[11].mxu1 }
 0x3a0   :  { %1867 = vpow2.f32 %v453_v19  ;;  %v455_v22 = vmul.f32 1.442695, %v450_v20 }
 0x3a2   :  { %v1864_v23 = vpop.eup %1863  ;;  %1869 = vpow2.f32 %v455_v22 }
 0x3a3   :  { %v559_v27 = vpop.f32.mrb[12].mxu1  ;;  %v344_v28 = vsel %vm230_vm3, %v1864_v23, 0.0 }
 0x3a4   :  { %v1866_v29 = vpop.eup %1865  ;;  %v560_v30 = vadd.f32 %v2139_v54, %v559_v27  ;;  %345 = vadd.xlane.f32.xlu0 %v344_v28  ;;  %v1690_v31 = vpop.f32.mrb[13].mxu1  ;;  %v1843_v28 = vld [vmem:[#allocation5 + $0x50] sm:$0xff]  }
 0x3a5   :  { %v562_v32 = vpop.f32.mrb[14].mxu1  ;;  %v347_v36 = vsel %vm230_vm3, %v1866_v29, 0.0  ;;  %1699 = vmatpush3.bf16.msra.mxu1 %v1843_v28 }
 0x3a6   :  { %v566_v33 = vmul.f32 1.442695, %v560_v30  ;;  %v563_v34 = vadd.f32 %v2141_v55, %v562_v32  ;;  %v1691_v35 = vpop.f32.mrb[15].mxu1  ;;  %1700 = vmatprep.subr.bf16.mxu1 %v2009_v15 }
 0x3a8   :  { %1871 = vpow2.f32 %v566_v33  ;;  %v568_v37 = vmul.f32 1.442695, %v563_v34  ;;  %348 = vadd.xlane.f32.xlu0 %v347_v36  ;;  %v1844_v33 = vld [vmem:[#allocation5 + $0x58] sm:$0xff]  }
 0x3a9   :  { %1701 = vmatpush3.bf16.msra.mxu1 %v1844_v33 }
 0x3aa   :  { %v1868_v38 = vpop.eup %1867  ;;  %1873 = vpow2.f32 %v568_v37  ;;  %1714 = vmatprep.subr.bf16.mxu1 %v2009_v15 }
 0x3ab   :  { %v457_v40 = vsel %vm230_vm3, %v1868_v38, 0.0 }
 0x3ac   :  { %v1870_v41 = vpop.eup %1869  ;;  %458 = vadd.xlane.f32.xlu1 %v457_v40 }
 0x3ad   :  { %v460_v42 = vsel %vm230_vm3, %v1870_v41, 0.0 }
 0x3ae   :  { %461 = vadd.xlane.f32.xlu0 %v460_v42 }
 0x3b2   :  { %v1872_v43 = vpop.eup %1871 }
 0x3b3   :  { %v570_v44 = vsel %vm230_vm3, %v1872_v43, 0.0 }
 0x3b4   :  { %v1874_v45 = vpop.eup %1873  ;;  %571 = vadd.xlane.f32.xlu1 %v570_v44 }
 0x3b5   :  { %v573_v46 = vsel %vm230_vm3, %v1874_v45, 0.0 }
 0x3b6   :  { %574 = vadd.xlane.f32.xlu0 %v573_v46 }
 0x3c5   :  { %468 = vrot.lane.b32.xlu1 %v2099_v39, %s2018_s14 }
 0x3c9   :  { %581 = vrot.lane.b32.xlu1 %v2099_v39, %s2019_s15 }
 0x3cc   :  { %355 = vrot.lane.b32.xlu0 %v2099_v39, %s2020_s16 }
 0x429   :  { %v233_v47 = vpop.xlane.xlu1 %232 }
 0x42a   :  { %1875 = vrcp.f32 %v233_v47 }
 0x42b   :  { %v236_v48 = vpop.xlane.xlu0 %235 }
 0x42c   :  { %1877 = vrcp.f32 %v236_v48 }
 0x431   :  { %v346_v49 = vpop.xlane.xlu0 %345 }
 0x434   :  { %v1876_v50 = vpop.eup %1875 }
 0x435   :  { %v349_v51 = vpop.xlane.xlu0 %348  ;;  %v239_v53 = vmul.f32 %v1876_v50, %v1860_v10 }
 0x436   :  { %v1878_v52 = vpop.eup %1877  ;;  %1879 = vrcp.f32 %v349_v51 }
 0x437   :  { %v240_v56 = vmul.f32 %v1878_v52, %v1862_v13  ;;  %1881 = vrcp.f32 %v346_v49 }
 0x439   :  { %v241_v57 = vpack.c.bf16 %v240_v56, %v239_v53  ;;  %v459_v39 = vpop.xlane.xlu1 %458 }
 0x43b   :  { %1659 = vmatmul.mubr.msk.bf16.vlgmr.msra.gmra.mrb[4].mxu0 %vm230_vm3, %v241_v57  ;;  %v462_v58 = vpop.xlane.xlu0 %461 }
 0x43c   :  { %1670 = vmatprep.mubr.msk.bf16.mxu0 %vm2010_vm1, %v2009_v15  ;;  %1883 = vrcp.f32 %v462_v58 }
 0x43d   :  { %1885 = vrcp.f32 %v459_v39 }
 0x440   :  { %v1880_v59 = vpop.eup %1879 }
 0x441   :  { %v1882_v61 = vpop.eup %1881  ;;  %v353_v62 = vmul.f32 %v1880_v59, %v1866_v29  ;;  %v572_v63 = vpop.xlane.xlu1 %571 }
 0x442   :  { %v352_v2 = vmul.f32 %v1882_v61, %v1864_v23 }
 0x443   :  { %v575_v60 = vpop.xlane.xlu0 %574 }
 0x444   :  { %1887 = vrcp.f32 %v575_v60  ;;  %v354_v4 = vpack.c.bf16 %v353_v62, %v352_v2  ;;  %v2194_v60 = vld [vmem:[#allocation5 + $0x78] sm:$0x2]  ;;  %v662_v62 = vsub.s32 3, %v2088_v24 }
 0x445   :  { %1889 = vrcp.f32 %v572_v63  ;;  %v469_v6 = vpop.permute.xlu1 %468  ;;  %v78_v61 = vunpack.c.l.bf16 %v2194_v60 }
 0x446   :  { %v1884_v5 = vpop.eup %1883 }
 0x447   :  { %v356_v3 = vpop.permute.xlu0 %355  ;;  %v1886_v7 = vpop.eup %1885  ;;  %v466_v8 = vmul.f32 %v1884_v5, %v1870_v41  ;;  %v663_v63 = vrot.slane %v78_v61, %v662_v62 }
 0x448   :  { %1669 = vmatpush3.bf16.msra.mxu0 %v356_v3  ;;  %v465_v9 = vmul.f32 %v1886_v7, %v1868_v38 }
 0x449   :  { %1680 = vmatprep.subr.bf16.mxu0 %v2009_v15  ;;  %v582_v12 = vpop.permute.xlu1 %581 }
 0x44a   :  { %v467_v10 = vpack.c.bf16 %v466_v8, %v465_v9 }
 0x44b   :  { %1671 = vmatmul.mubr.msk.bf16.vlgmr.msra.gmra.mrb[8].mxu0 %vm230_vm3, %v354_v4 }
 0x44c   :  { %1681 = vmatpush3.bf16.msra.mxu0 %v469_v6  ;;  %1682 = vmatprep.mubr.msk.bf16.mxu0 %vm2010_vm1, %v2009_v15 }
 0x44d   :  { %1692 = vmatprep.subr.bf16.mxu0 %v2009_v15 }
 0x44e   :  { %v1888_v11 = vpop.eup %1887 }
 0x44f   :  { %v1890_v13 = vpop.eup %1889  ;;  %v579_v14 = vmul.f32 %v1888_v11, %v1874_v45 }
 0x450   :  { %v578_v16 = vmul.f32 %v1890_v13, %v1872_v43 }
 0x452   :  { %v580_v17 = vpack.c.bf16 %v579_v14, %v578_v16 }
 0x453   :  { %1683 = vmatmul.mubr.msk.bf16.vlgmr.msra.gmra.mrb[12].mxu0 %vm230_vm3, %v467_v10 }
 0x454   :  { %1693 = vmatpush3.bf16.msra.mxu0 %v582_v12  ;;  %1694 = vmatprep.mubr.msk.bf16.mxu0 %vm2010_vm1, %v2009_v15 }
 0x455   :  { %1706 = vmatprep.subr.bf16.mxu0 %v2009_v15 }
 0x45b   :  { %1695 = vmatmul.mubr.msk.bf16.vlgmr.msra.gmra.mrb[16].mxu0 %vm230_vm3, %v580_v17 }
 0x45c   :  { %1710 = vmatprep.mubr.msk.bf16.mxu0 %vm2010_vm1, %v2009_v15 }
 0x50e   :  { %v282_v18 = vpop.f32.mrb[4].mxu0 }
 0x50f   :  { %v1660_v19 = vpop.f32.mrb[5].mxu0 }
 0x510   :  { %v285_v20 = vpop.f32.mrb[6].mxu0 }
 0x511   :  { %v1661_v21 = vpop.f32.mrb[7].mxu0 }
 0x512   :  { %v1845_v21 = vld [vmem:[#allocation5 + $0x10] sm:$0xff]  }
 0x513   :  { %1707 = vmatpush3.bf16.msra.mxu0 %v1845_v21 }
 0x514   :  { %1708 = vmatprep.subr.bf16.mxu0 %v2009_v15 }
 0x51e   :  { %v395_v22 = vpop.f32.mrb[8].mxu0 }
 0x51f   :  { %v1672_v23 = vpop.f32.mrb[9].mxu0 }
 0x520   :  { %v398_v27 = vpop.f32.mrb[10].mxu0 }
 0x521   :  { %v1811_v29 = vpack.i.bf16 %v398_v27, %v395_v22  ;;  %v1673_v30 = vpop.f32.mrb[11].mxu0  ;;  %v1846_v22 = vld [vmem:[#allocation5 + $0x18] sm:$0xff]  }
 0x522   :  { %1709 = vmatpush3.bf16.msra.mxu0 %v1846_v22 }
 0x523   :  { %1812 = vrot.lane.b32.xlu1 %v1811_v29, %s2005_s20  ;;  %1720 = vmatprep.subr.bf16.mxu0 %v2009_v15 }
 0x526   :  { %v508_v31 = vpop.f32.mrb[12].mxu0 }
 0x527   :  { %v1684_v32 = vpop.f32.mrb[13].mxu0 }
 0x528   :  { %v511_v34 = vpop.f32.mrb[14].mxu0  ;;  %v750_v32 = vsub.s32 1, %v2088_v24 }
 0x529   :  { %v1816_v35 = vpack.i.bf16 %v511_v34, %v508_v31  ;;  %v1685_v36 = vpop.f32.mrb[15].mxu0 }
 0x52a   :  { %v751_v34 = vrot.slane %v76_v26, %v750_v32 }
 0x52b   :  { %1817 = vrot.lane.b32.xlu0 %v1816_v35, %s2021_s17 }
 0x52e   :  { %v621_v37 = vpop.f32.mrb[16].mxu0 }
 0x52f   :  { %v1696_v38 = vpop.f32.mrb[17].mxu0 }
 0x530   :  { %v624_v40 = vpop.f32.mrb[18].mxu0 }
 0x531   :  { %v1821_v41 = vpack.i.bf16 %v624_v40, %v621_v37  ;;  %v1697_v42 = vpop.f32.mrb[19].mxu0 }
 0x533   :  { %1822 = vrot.lane.b32.xlu1 %v1821_v41, %s2022_s18 }
 0x595   :  { %v1813_v43 = vpop.permute.xlu1 %1812 }
 0x596   :  { %v1815_v45 = vunpack.i.h.bf16 %v1813_v43  ;;  %v1814_v46 = vunpack.i.l.bf16 %v1813_v43 }
 0x598   :  { %v653_v50 = vsel %vm178_vm2, %v285_v20, %v1815_v45  ;;  %v652_v51 = vsel %vm178_vm2, %v282_v18, %v1814_v46 }
 0x59d   :  { %v1818_v44 = vpop.permute.xlu0 %1817 }
 0x59e   :  { %v1820_v47 = vunpack.i.h.bf16 %v1818_v44  ;;  %v1819_v48 = vunpack.i.l.bf16 %v1818_v44 }
 0x5a0   :  { %v655_v56 = vsel %vm230_vm3, %v653_v50, %v1820_v47  ;;  %v654_v57 = vsel %vm230_vm3, %v652_v51, %v1819_v48 }
 0x5a5   :  { %v1823_v49 = vpop.permute.xlu1 %1822 }
 0x5a6   :  { %v1825_v52 = vunpack.i.h.bf16 %v1823_v49  ;;  %v1824_v53 = vunpack.i.l.bf16 %v1823_v49 }
 0x5a8   :  { %v658_v58 = vsel %vm656_vm4, %v655_v56, %v1825_v52  ;;  %v657_v39 = vsel %vm656_vm4, %v654_v57, %v1824_v53 }
 0x5a9   :  { %v659_v59 = vpack.c.bf16 %v658_v58, %v657_v39 }
 0x5ab   :  { %1703 = vmatmul.mubr.msk.bf16.vlgmr.msra.gmra.mrb[16].mxu1 %vm83_vm0, %v659_v59 }
 0x5ac   :  { %1716 = vmatprep.mubr.msk.bf16.mxu1 %vm2010_vm1, %v2009_v15 }
 0x67e   :  { %v713_v2 = vpop.f32.mrb[16].mxu1 }
 0x67f   :  { %v714_v3 = vadd.f32 %v713_v2, %v663_v63  ;;  %v1704_v4 = vpop.f32.mrb[17].mxu1 }
 0x680   :  { %v716_v5 = vpop.f32.mrb[18].mxu1 }
 0x681   :  { %v2201_v6 = vadd.f32 %v714_v3, %v2068_v0  ;;  %v717_v7 = vadd.f32 %v716_v5, %v663_v63  ;;  %v1705_v8 = vpop.f32.mrb[19].mxu1 }
 0x683   :  { %v2204_v9 = vadd.f32 %v717_v7, %v2070_v1  ;;  %v722_v10 = vsel %vm83_vm0, %v2201_v6, 0.0 }
 0x684   :  { %723 = vadd.xlane.f32.xlu0 %v722_v10 }
 0x685   :  { %v725_v11 = vsel %vm83_vm0, %v2204_v9, 0.0 }
 0x686   :  { %726 = vadd.xlane.f32.xlu1 %v725_v11 }
 0x711   :  { %v724_v12 = vpop.xlane.xlu0 %723 }
 0x712   :  { %v728_v13 = vmul.f32 0.03125, %v724_v12 }
 0x713   :  { %v727_v14 = vpop.xlane.xlu1 %726 }
 0x714   :  { %v730_v16 = vsub.f32 %v2201_v6, %v728_v13  ;;  %v729_v0 = vmul.f32 0.03125, %v727_v14 }
 0x716   :  { %v731_v17 = vsub.f32 %v2204_v9, %v729_v0  ;;  %v732_v18 = vmul.f32 %v730_v16, %v730_v16 }
 0x718   :  { %v734_v1 = vsel %vm83_vm0, %v732_v18, 0.0  ;;  %v733_v19 = vmul.f32 %v731_v17, %v731_v17 }
 0x719   :  { %735 = vadd.xlane.f32.xlu0 %v734_v1 }
 0x71a   :  { %v737_v20 = vsel %vm83_vm0, %v733_v19, 0.0 }
 0x71d   :  { %738 = vadd.xlane.f32.xlu0 %v737_v20 }
 0x7a6   :  { %v736_v23 = vpop.xlane.xlu0 %735 }
 0x7a7   :  { %v740_v27 = vmul.f32 0.03125, %v736_v23 }
 0x7a9   :  { %v742_v28 = vadd.f32 1e-05, %v740_v27 }
 0x7aa   :  { %v739_v29 = vpop.xlane.xlu0 %738 }
 0x7ab   :  { %1891 = vrsqrt.f32 %v742_v28  ;;  %v741_v30 = vmul.f32 0.03125, %v739_v29 }
 0x7ad   :  { %v743_v31 = vadd.f32 1e-05, %v741_v30 }
 0x7af   :  { %1893 = vrsqrt.f32 %v743_v31 }
 0x7b5   :  { %v1892_v33 = vpop.eup %1891 }
 0x7b6   :  { %v746_v35 = vmul.f32 %v1892_v33, %v730_v16 }
 0x7b8   :  { %v752_v38 = vmul.f32 %v751_v34, %v746_v35 }
 0x7b9   :  { %v1894_v36 = vpop.eup %1893 }
 0x7ba   :  { %v747_v37 = vmul.f32 %v1894_v36, %v731_v17 }
 0x7bc   :  { %v753_v40 = vmul.f32 %v751_v34, %v747_v37 }
 0x7be   :  { %v754_v41 = vpack.c.bf16 %v753_v40, %v752_v38 }
 0x7c0   :  { %1711 = vmatmul.mubr.msk.bf16.vlgmr.msra.gmra.mrb[20].mxu0 %vm83_vm0, %v754_v41 }
 0x7c1   :  { %1722 = vmatprep.mubr.msk.bf16.mxu0 %vm2010_vm1, %v2009_v15 }
 0x893   :  { %v804_v42 = vpop.f32.mrb[20].mxu0 }
 0x894   :  { %v1712_v43 = vpop.f32.mrb[21].mxu0 }
 0x895   :  { %v807_v44 = vpop.f32.mrb[22].mxu0 }
 0x896   :  { %v2222_v45 = vpack.c.bf16 %v807_v44, %v804_v42  ;;  %v1713_v46 = vpop.f32.mrb[23].mxu0 }
 0x898   :  { %926 = vrot.lane.b32.xlu1 %v2222_v45, %s2011_s1  ;;  %813 = vrot.lane.b32.xlu0 %v2222_v45, %s2012_s8 }
 0x89c   :  { %924 = vrot.lane.b32.xlu1 %v2222_v45, %s2013_s9  ;;  %1037 = vrot.lane.b32.xlu0 %v2222_v45, %s2014_s10 }
 0x8a0   :  { %1039 = vrot.lane.b32.xlu1 %v2222_v45, %s2015_s11  ;;  %1150 = vrot.lane.b32.xlu0 %v2222_v45, %s2016_s12 }
 0x8a4   :  { %1152 = vrot.lane.b32.xlu1 %v2222_v45, %s2017_s13 }
 0x8a8   :  { %877 = vrot.lane.b32.xlu1 %v2222_v45, %s2007_s0 }
 0x90a   :  { %v927_v25 = vpop.permute.xlu1 %926  ;;  %v814_v26 = vpop.permute.xlu0 %813 }
 0x90b   :  { %v819_v47 = vsel %vm178_vm2, %v814_v26, 0  ;;  %v932_v50 = vsel %vm178_vm2, %v927_v25, 0 }
 0x90c   :  { %1715 = vmatpush3.bf16.xpose.msra.mxu1 %v819_v47 }
 0x90d   :  { %1726 = vmatprep.subr.bf16.mxu1 %v2009_v15 }
 0x90e   :  { %v925_v48 = vpop.permute.xlu1 %924  ;;  %v1038_v56 = vpop.permute.xlu0 %1037 }
 0x912   :  { %v1040_v49 = vpop.permute.xlu1 %1039  ;;  %v1151_v58 = vpop.permute.xlu0 %1150 }
 0x913   :  { %1717 = vmatmul.mubr.msk.bf16.vlgmr.msra.gmra.mrb[20].mxu1 %vm178_vm2, %v2222_v45  ;;  %v1045_v53 = vsel %vm178_vm2, %v1040_v49, 0 }
 0x914   :  { %1727 = vmatpush3.bf16.xpose.msra.mxu1 %v932_v50  ;;  %1728 = vmatprep.mubr.msk.bf16.mxu1 %vm2010_vm1, %v2009_v15 }
 0x915   :  { %1738 = vmatprep.subr.bf16.mxu1 %v2009_v15 }
 0x916   :  { %v1153_v51 = vpop.permute.xlu1 %1152 }
 0x917   :  { %v1158_v57 = vsel %vm178_vm2, %v1153_v51, 0 }
 0x91a   :  { %v878_v52 = vpop.permute.xlu1 %877 }
 0x91b   :  { %1721 = vmatpush3.bf16.msra.mxu0 %v878_v52  ;;  %1729 = vmatmul.mubr.msk.bf16.vlgmr.msra.gmra.mrb[24].mxu1 %vm178_vm2, %v925_v48 }
 0x91c   :  { %1739 = vmatpush3.bf16.xpose.msra.mxu1 %v1045_v53  ;;  %1740 = vmatprep.mubr.msk.bf16.mxu1 %vm2010_vm1, %v2009_v15 }
 0x91d   :  { %1750 = vmatprep.subr.bf16.mxu1 %v2009_v15  ;;  %1732 = vmatprep.subr.bf16.mxu0 %v2009_v15 }
 0x923   :  { %1741 = vmatmul.mubr.msk.bf16.vlgmr.msra.gmra.mrb[28].mxu1 %vm178_vm2, %v1038_v56 }
 0x924   :  { %1751 = vmatpush3.bf16.xpose.msra.mxu1 %v1158_v57  ;;  %1752 = vmatprep.mubr.msk.bf16.mxu1 %vm2010_vm1, %v2009_v15 }
 0x925   :  { %1762 = vmatprep.subr.bf16.mxu1 %v2009_v15 }
 0x92b   :  { %1753 = vmatmul.mubr.msk.bf16.vlgmr.msra.gmra.mrb[32].mxu1 %vm178_vm2, %v1151_v58 }
 0x92c   :  { %1766 = vmatprep.mubr.msk.bf16.mxu1 %vm2010_vm1, %v2009_v15 }
 0x9e6   :  { %v855_v39 = vpop.f32.mrb[20].mxu1 }
 0x9e7   :  { %v856_v59 = vadd.f32 %v2139_v54, %v855_v39  ;;  %v1718_v62 = vpop.f32.mrb[21].mxu1 }
 0x9e8   :  { %v858_v63 = vpop.f32.mrb[22].mxu1 }
 0x9e9   :  { %v862_v2 = vmul.f32 1.442695, %v856_v59  ;;  %v859_v3 = vadd.f32 %v2141_v55, %v858_v63  ;;  %v1719_v4 = vpop.f32.mrb[23].mxu1 }
 0x9eb   :  { %1895 = vpow2.f32 %v862_v2  ;;  %v864_v5 = vmul.f32 1.442695, %v859_v3 }
 0x9ed   :  { %1897 = vpow2.f32 %v864_v5 }
 0x9ee   :  { %v968_v7 = vpop.f32.mrb[24].mxu1 }
 0x9ef   :  { %v969_v8 = vadd.f32 %v2139_v54, %v968_v7  ;;  %v1730_v10 = vpop.f32.mrb[25].mxu1 }
 0x9f0   :  { %v971_v11 = vpop.f32.mrb[26].mxu1 }
 0x9f1   :  { %v975_v12 = vmul.f32 1.442695, %v969_v8  ;;  %v972_v13 = vadd.f32 %v2141_v55, %v971_v11  ;;  %v1731_v14 = vpop.f32.mrb[27].mxu1 }
 0x9f3   :  { %1899 = vpow2.f32 %v975_v12  ;;  %v977_v16 = vmul.f32 1.442695, %v972_v13 }
 0x9f5   :  { %v1896_v0 = vpop.eup %1895  ;;  %1901 = vpow2.f32 %v977_v16 }
 0x9f6   :  { %v1081_v17 = vpop.f32.mrb[28].mxu1  ;;  %v866_v18 = vsel %vm230_vm3, %v1896_v0, 0.0 }
 0x9f7   :  { %v1898_v1 = vpop.eup %1897  ;;  %v1082_v19 = vadd.f32 %v2139_v54, %v1081_v17  ;;  %867 = vadd.xlane.f32.xlu1 %v866_v18  ;;  %v1742_v20 = vpop.f32.mrb[29].mxu1 }
 0x9f8   :  { %v1084_v21 = vpop.f32.mrb[30].mxu1  ;;  %v869_v22 = vsel %vm230_vm3, %v1898_v1, 0.0 }
 0x9f9   :  { %v1088_v23 = vmul.f32 1.442695, %v1082_v19  ;;  %v1085_v27 = vadd.f32 %v2141_v55, %v1084_v21  ;;  %870 = vadd.xlane.f32.xlu0 %v869_v22  ;;  %v1743_v28 = vpop.f32.mrb[31].mxu1 }
 0x9fb   :  { %1903 = vpow2.f32 %v1088_v23  ;;  %v1090_v29 = vmul.f32 1.442695, %v1085_v27 }
 0x9fd   :  { %v1900_v30 = vpop.eup %1899  ;;  %1905 = vpow2.f32 %v1090_v29 }
 0x9fe   :  { %v1194_v31 = vpop.f32.mrb[32].mxu1  ;;  %v979_v32 = vsel %vm230_vm3, %v1900_v30, 0.0 }
 0x9ff   :  { %v1902_v33 = vpop.eup %1901  ;;  %v1195_v34 = vadd.f32 %v2139_v54, %v1194_v31  ;;  %980 = vadd.xlane.f32.xlu0 %v979_v32  ;;  %v1754_v35 = vpop.f32.mrb[33].mxu1 }
 0xa00   :  { %v1197_v36 = vpop.f32.mrb[34].mxu1  ;;  %v982_v41 = vsel %vm230_vm3, %v1902_v33, 0.0  ;;  %v1848_v35 = vld [vmem:[#allocation5 + $0x68] sm:$0xff]  }
 0xa01   :  { %v1201_v37 = vmul.f32 1.442695, %v1195_v34  ;;  %v1198_v38 = vadd.f32 %v2141_v55, %v1197_v36  ;;  %v1755_v40 = vpop.f32.mrb[35].mxu1 }
 0xa03   :  { %1907 = vpow2.f32 %v1201_v37  ;;  %v1203_v42 = vmul.f32 1.442695, %v1198_v38  ;;  %983 = vadd.xlane.f32.xlu0 %v982_v41 }
 0xa05   :  { %v1904_v43 = vpop.eup %1903  ;;  %1909 = vpow2.f32 %v1203_v42 }
 0xa06   :  { %v1092_v44 = vsel %vm230_vm3, %v1904_v43, 0.0 }
 0xa07   :  { %v1906_v46 = vpop.eup %1905  ;;  %1093 = vadd.xlane.f32.xlu1 %v1092_v44 }
 0xa08   :  { %v1095_v54 = vsel %vm230_vm3, %v1906_v46, 0.0 }
 0xa09   :  { %1096 = vadd.xlane.f32.xlu0 %v1095_v54 }
 0xa0d   :  { %v1908_v25 = vpop.eup %1907 }
 0xa0e   :  { %v1205_v26 = vsel %vm230_vm3, %v1908_v25, 0.0 }
 0xa0f   :  { %v1910_v47 = vpop.eup %1909  ;;  %1206 = vadd.xlane.f32.xlu1 %v1205_v26 }
 0xa10   :  { %v1208_v55 = vsel %vm230_vm3, %v1910_v47, 0.0 }
 0xa11   :  { %1209 = vadd.xlane.f32.xlu0 %v1208_v55 }
 0xa20   :  { %1103 = vrot.lane.b32.xlu1 %v2222_v45, %s2018_s14 }
 0xa24   :  { %1216 = vrot.lane.b32.xlu1 %v2222_v45, %s2019_s15 }
 0xa27   :  { %990 = vrot.lane.b32.xlu0 %v2222_v45, %s2020_s16 }
 0xa84   :  { %v868_v48 = vpop.xlane.xlu1 %867 }
 0xa85   :  { %1911 = vrcp.f32 %v868_v48 }
 0xa86   :  { %v871_v49 = vpop.xlane.xlu0 %870 }
 0xa87   :  { %1913 = vrcp.f32 %v871_v49 }
 0xa8c   :  { %v981_v50 = vpop.xlane.xlu0 %980 }
 0xa8f   :  { %v1912_v51 = vpop.eup %1911 }
 0xa90   :  { %v984_v52 = vpop.xlane.xlu0 %983  ;;  %v874_v56 = vmul.f32 %v1912_v51, %v1896_v0 }
 0xa91   :  { %v1914_v53 = vpop.eup %1913  ;;  %1915 = vrcp.f32 %v984_v52 }
 0xa92   :  { %v875_v57 = vmul.f32 %v1914_v53, %v1898_v1  ;;  %1917 = vrcp.f32 %v981_v50 }
 0xa94   :  { %v876_v58 = vpack.c.bf16 %v875_v57, %v874_v56  ;;  %v1094_v45 = vpop.xlane.xlu1 %1093 }
 0xa96   :  { %1723 = vmatmul.mubr.msk.bf16.vlgmr.msra.gmra.mrb[24].mxu0 %vm230_vm3, %v876_v58  ;;  %v1097_v39 = vpop.xlane.xlu0 %1096 }
 0xa97   :  { %1734 = vmatprep.mubr.msk.bf16.mxu0 %vm2010_vm1, %v2009_v15  ;;  %1919 = vrcp.f32 %v1097_v39 }
 0xa98   :  { %1921 = vrcp.f32 %v1094_v45  ;;  %v2313_v45 = vld [vmem:[#allocation5 + $0x78] sm:$0x4] }
 0xa9b   :  { %v1916_v59 = vpop.eup %1915 }
 0xa9c   :  { %v1918_v63 = vpop.eup %1917  ;;  %v988_v2 = vmul.f32 %v1916_v59, %v1902_v33  ;;  %v1207_v3 = vpop.xlane.xlu1 %1206  ;;  %v80_v59 = vunpack.c.l.bf16 %v2313_v45 }
 0xa9d   :  { %v987_v4 = vmul.f32 %v1918_v63, %v1900_v30  ;;  %v1847_v30 = vld [vmem:[#allocation5 + $0x60] sm:$0xff]  }
 0xa9e   :  { %v1210_v62 = vpop.xlane.xlu0 %1209  ;;  %1763 = vmatpush3.bf16.msra.mxu1 %v1847_v30 }
 0xa9f   :  { %1923 = vrcp.f32 %v1210_v62  ;;  %v989_v7 = vpack.c.bf16 %v988_v2, %v987_v4  ;;  %1764 = vmatprep.subr.bf16.mxu1 %v2009_v15  ;;  %v1296_v62 = vsub.s32 4, %v2088_v24 }
 0xaa0   :  { %1925 = vrcp.f32 %v1207_v3  ;;  %v1104_v10 = vpop.permute.xlu1 %1103 }
 0xaa1   :  { %v1920_v8 = vpop.eup %1919  ;;  %v1297_v63 = vrot.slane %v80_v59, %v1296_v62 }
 0xaa2   :  { %v991_v5 = vpop.permute.xlu0 %990  ;;  %v1922_v11 = vpop.eup %1921  ;;  %v1101_v12 = vmul.f32 %v1920_v8, %v1906_v46  ;;  %1765 = vmatpush3.bf16.msra.mxu1 %v1848_v35 }
 0xaa3   :  { %1733 = vmatpush3.bf16.msra.mxu0 %v991_v5  ;;  %v1100_v13 = vmul.f32 %v1922_v11, %v1904_v43  ;;  %1778 = vmatprep.subr.bf16.mxu1 %v2009_v15 }
 0xaa4   :  { %1744 = vmatprep.subr.bf16.mxu0 %v2009_v15  ;;  %v1217_v0 = vpop.permute.xlu1 %1216 }
 0xaa5   :  { %v1102_v14 = vpack.c.bf16 %v1101_v12, %v1100_v13 }
 0xaa6   :  { %1735 = vmatmul.mubr.msk.bf16.vlgmr.msra.gmra.mrb[28].mxu0 %vm230_vm3, %v989_v7 }
 0xaa7   :  { %1745 = vmatpush3.bf16.msra.mxu0 %v1104_v10  ;;  %1746 = vmatprep.mubr.msk.bf16.mxu0 %vm2010_vm1, %v2009_v15 }
 0xaa8   :  { %1756 = vmatprep.subr.bf16.mxu0 %v2009_v15 }
 0xaa9   :  { %v1924_v16 = vpop.eup %1923 }
 0xaaa   :  { %v1926_v17 = vpop.eup %1925  ;;  %v1214_v18 = vmul.f32 %v1924_v16, %v1910_v47 }
 0xaab   :  { %v1213_v1 = vmul.f32 %v1926_v17, %v1908_v25 }
 0xaad   :  { %v1215_v19 = vpack.c.bf16 %v1214_v18, %v1213_v1 }
 0xaae   :  { %1747 = vmatmul.mubr.msk.bf16.vlgmr.msra.gmra.mrb[32].mxu0 %vm230_vm3, %v1102_v14 }
 0xaaf   :  { %1757 = vmatpush3.bf16.msra.mxu0 %v1217_v0  ;;  %1758 = vmatprep.mubr.msk.bf16.mxu0 %vm2010_vm1, %v2009_v15 }
 0xab0   :  { %1770 = vmatprep.subr.bf16.mxu0 %v2009_v15 }
 0xab6   :  { %1759 = vmatmul.mubr.msk.bf16.vlgmr.msra.gmra.mrb[36].mxu0 %vm230_vm3, %v1215_v19 }
 0xab7   :  { %1774 = vmatprep.mubr.msk.bf16.mxu0 %vm2010_vm1, %v2009_v15 }
 0xb69   :  { %v917_v20 = vpop.f32.mrb[24].mxu0 }
 0xb6a   :  { %v1724_v21 = vpop.f32.mrb[25].mxu0 }
 0xb6b   :  { %v920_v22 = vpop.f32.mrb[26].mxu0  ;;  %v1849_v21 = vld [vmem:[#allocation5 + $0x20] sm:$0xff]  }
 0xb6c   :  { %v1725_v23 = vpop.f32.mrb[27].mxu0  ;;  %1771 = vmatpush3.bf16.msra.mxu0 %v1849_v21 }
 0xb6d   :  { %1772 = vmatprep.subr.bf16.mxu0 %v2009_v15  ;;  %v1851_v23 = vld [vmem:[#allocation5 + $0x30] sm:$0xff]  }
 0xb79   :  { %v1030_v27 = vpop.f32.mrb[28].mxu0 }
 0xb7a   :  { %v1736_v28 = vpop.f32.mrb[29].mxu0 }
 0xb7b   :  { %v1033_v29 = vpop.f32.mrb[30].mxu0 }
 0xb7c   :  { %v1826_v31 = vpack.i.bf16 %v1033_v29, %v1030_v27  ;;  %v1737_v32 = vpop.f32.mrb[31].mxu0  ;;  %v1852_v27 = vld [vmem:[#allocation5 + $0x38] sm:$0xff]  }
 0xb7e   :  { %1827 = vrot.lane.b32.xlu1 %v1826_v31, %s2005_s20 }
 0xb81   :  { %v1143_v33 = vpop.f32.mrb[32].mxu0 }
 0xb82   :  { %v1748_v34 = vpop.f32.mrb[33].mxu0 }
 0xb83   :  { %v1146_v36 = vpop.f32.mrb[34].mxu0  ;;  %v1384_v34 = vsub.s32 2, %v2088_v24 }
 0xb84   :  { %v1831_v37 = vpack.i.bf16 %v1146_v36, %v1143_v33  ;;  %v1749_v38 = vpop.f32.mrb[35].mxu0 }
 0xb85   :  { %v1385_v36 = vrot.slane %v78_v61, %v1384_v34 }
 0xb86   :  { %1832 = vrot.lane.b32.xlu0 %v1831_v37, %s2021_s17 }
 0xb89   :  { %v1256_v40 = vpop.f32.mrb[36].mxu0 }
 0xb8a   :  { %v1760_v41 = vpop.f32.mrb[37].mxu0 }
 0xb8b   :  { %v1259_v42 = vpop.f32.mrb[38].mxu0 }
 0xb8c   :  { %v1836_v43 = vpack.i.bf16 %v1259_v42, %v1256_v40  ;;  %v1761_v44 = vpop.f32.mrb[39].mxu0 }
 0xb8d   :  { %v1853_v44 = vld [vmem:[#allocation5 + $0x40] sm:$0xff]  }
 0xb8e   :  { %1837 = vrot.lane.b32.xlu1 %v1836_v43, %s2022_s18 }
 0xbf0   :  { %v1828_v46 = vpop.permute.xlu1 %1827 }
 0xbf1   :  { %v1830_v25 = vunpack.i.h.bf16 %v1828_v46  ;;  %v1829_v26 = vunpack.i.l.bf16 %v1828_v46  ;;  %v1854_v46 = vld [vmem:[#allocation5 + $0x48] sm:$0xff]  }
 0xbf3   :  { %v1288_v49 = vsel %vm178_vm2, %v920_v22, %v1830_v25  ;;  %v1287_v50 = vsel %vm178_vm2, %v917_v20, %v1829_v26  ;;  %v1850_v22 = vld [vmem:[#allocation5 + $0x28] sm:$0xff]  }
 0xbf4   :  { %1773 = vmatpush3.bf16.msra.mxu0 %v1850_v22 }
 0xbf8   :  { %v1833_v54 = vpop.permute.xlu0 %1832 }
 0xbf9   :  { %v1835_v47 = vunpack.i.h.bf16 %v1833_v54  ;;  %v1834_v55 = vunpack.i.l.bf16 %v1833_v54  ;;  %v1391_v54 = vsub.s32 5, %v2088_v24 }
 0xbfb   :  { %v1290_v53 = vsel %vm230_vm3, %v1288_v49, %v1835_v47  ;;  %v1289_v56 = vsel %vm230_vm3, %v1287_v50, %v1834_v55  ;;  %v1392_v25 = vrot.slane %v80_v59, %v1391_v54 }
 0xc00   :  { %v1838_v48 = vpop.permute.xlu1 %1837 }
 0xc01   :  { %v1840_v51 = vunpack.i.h.bf16 %v1838_v48  ;;  %v1839_v52 = vunpack.i.l.bf16 %v1838_v48 }
 0xc03   :  { %v1292_v57 = vsel %vm656_vm4, %v1290_v53, %v1840_v51  ;;  %v1291_v58 = vsel %vm656_vm4, %v1289_v56, %v1839_v52  ;;  %v81_v52 = vld [vmem:[#allocation5 + $0x78] sm:$0x8] }
 0xc04   :  { %v1293_v39 = vpack.c.bf16 %v1292_v57, %v1291_v58  ;;  %v82_v53 = vunpack.c.l.bf16 %v81_v52 }
 0xc06   :  { %1767 = vmatmul.mubr.msk.bf16.vlgmr.msra.gmra.mrb[36].mxu1 %vm83_vm0, %v1293_v39 }
 0xc07   :  { %1786 = vmatprep.mubr.msk.bf16.mxu1 %vm2010_vm1, %v2009_v15  ;;  %1779 = vmatpush3.bf16.msra.mxu1 %v1851_v23 }
 0xc08   :  { %1780 = vmatprep.subr.bf16.mxu1 %v2009_v15 }
 0xc0b   :  { %1781 = vmatpush3.bf16.msra.mxu1 %v1852_v27 }
 0xc0c   :  { %1782 = vmatprep.subr.bf16.mxu1 %v2009_v15 }
 0xc0f   :  { %1783 = vmatpush3.bf16.msra.mxu1 %v1853_v44 }
 0xc10   :  { %1784 = vmatprep.subr.bf16.mxu1 %v2009_v15  ;;  %v1454_v15 = vsub.s32 6, %v2088_v24 }
 0xc12   :  { %v1455_v56 = vrot.slane %v82_v53, %v1454_v15 }
 0xc13   :  { %1785 = vmatpush3.bf16.msra.mxu1 %v1854_v46 }
 0xcd9   :  { %v1347_v2 = vpop.f32.mrb[36].mxu1 }
 0xcda   :  { %v1348_v3 = vadd.f32 %v1347_v2, %v1297_v63  ;;  %v1768_v4 = vpop.f32.mrb[37].mxu1 }
 0xcdb   :  { %v1350_v5 = vpop.f32.mrb[38].mxu1 }
 0xcdc   :  { %v2318_v7 = vadd.f32 %v1348_v3, %v2201_v6  ;;  %v1351_v8 = vadd.f32 %v1350_v5, %v1297_v63  ;;  %v1769_v10 = vpop.f32.mrb[39].mxu1 }
 0xcde   :  { %v2321_v11 = vadd.f32 %v1351_v8, %v2204_v9  ;;  %v1356_v12 = vsel %vm83_vm0, %v2318_v7, 0.0 }
 0xcdf   :  { %1357 = vadd.xlane.f32.xlu0 %v1356_v12 }
 0xce0   :  { %v1359_v13 = vsel %vm83_vm0, %v2321_v11, 0.0 }
 0xce1   :  { %1360 = vadd.xlane.f32.xlu1 %v1359_v13 }
 0xd6c   :  { %v1358_v14 = vpop.xlane.xlu0 %1357 }
 0xd6d   :  { %v1362_v16 = vmul.f32 0.03125, %v1358_v14 }
 0xd6e   :  { %v1361_v0 = vpop.xlane.xlu1 %1360 }
 0xd6f   :  { %v1364_v17 = vsub.f32 %v2318_v7, %v1362_v16  ;;  %v1363_v6 = vmul.f32 0.03125, %v1361_v0 }
 0xd71   :  { %v1365_v18 = vsub.f32 %v2321_v11, %v1363_v6  ;;  %v1366_v1 = vmul.f32 %v1364_v17, %v1364_v17 }
 0xd73   :  { %v1368_v9 = vsel %vm83_vm0, %v1366_v1, 0.0  ;;  %v1367_v19 = vmul.f32 %v1365_v18, %v1365_v18 }
 0xd74   :  { %1369 = vadd.xlane.f32.xlu0 %v1368_v9 }
 0xd75   :  { %v1371_v20 = vsel %vm83_vm0, %v1367_v19, 0.0 }
 0xd78   :  { %1372 = vadd.xlane.f32.xlu0 %v1371_v20 }
 0xe01   :  { %v1370_v28 = vpop.xlane.xlu0 %1369 }
 0xe02   :  { %v1374_v29 = vmul.f32 0.03125, %v1370_v28 }
 0xe04   :  { %v1376_v30 = vadd.f32 1e-05, %v1374_v29 }
 0xe05   :  { %v1373_v31 = vpop.xlane.xlu0 %1372 }
 0xe06   :  { %1927 = vrsqrt.f32 %v1376_v30  ;;  %v1375_v32 = vmul.f32 0.03125, %v1373_v31 }
 0xe08   :  { %v1377_v33 = vadd.f32 1e-05, %v1375_v32 }
 0xe0a   :  { %1929 = vrsqrt.f32 %v1377_v33 }
 0xe10   :  { %v1928_v35 = vpop.eup %1927 }
 0xe11   :  { %v1380_v37 = vmul.f32 %v1928_v35, %v1364_v17 }
 0xe13   :  { %v1386_v42 = vmul.f32 %v1385_v36, %v1380_v37 }
 0xe14   :  { %v1930_v38 = vpop.eup %1929 }
 0xe15   :  { %v1381_v40 = vmul.f32 %v1930_v38, %v1365_v18  ;;  %v1525_v39 = vadd.f32 %v1386_v42, %v2318_v7 }
 0xe17   :  { %v1387_v41 = vmul.f32 %v1385_v36, %v1381_v40 }
 0xe19   :  { %v1388_v43 = vpack.c.bf16 %v1387_v41, %v1386_v42  ;;  %v1526_v2 = vadd.f32 %v1387_v41, %v2321_v11 }
 0xe1b   :  { %1775 = vmatmul.mubr.msk.bf16.vlgmr.msra.gmra.mrb[40].mxu0 %vm83_vm0, %v1388_v43 }
 0xeee   :  { %v1442_v26 = vpop.f32.mrb[40].mxu0 }
 0xeef   :  { %v1443_v60 = vadd.f32 %v1442_v26, %v1392_v25  ;;  %v1776_v61 = vpop.f32.mrb[41].mxu0 }
 0xef0   :  { %v1445_v47 = vpop.f32.mrb[42].mxu0 }
 0xef1   :  { %v1446_v55 = vadd.f32 %v1445_v47, %v1392_v25  ;;  %v1777_v48 = vpop.f32.mrb[43].mxu0  ;;  %v1449_v49 = vmax.f32 %v1443_v60, 0.0 }
 0xef3   :  { %v1450_v50 = vmax.f32 %v1446_v55, 0.0 }
 0xef5   :  { %v1451_v51 = vpack.c.bf16 %v1450_v50, %v1449_v49 }
 0xef7   :  { %1787 = vmatmul.mubr.msk.bf16.vlgmr.msra.gmra.mrb[40].mxu1 %vm1480_vm5, %v1451_v51 }
 0xfca   :  { %v1518_v57 = vpop.f32.mrb[40].mxu1 }
 0xfcb   :  { %v1519_v58 = vadd.f32 %v1518_v57, %v1455_v56  ;;  %v1788_v45 = vpop.f32.mrb[41].mxu1 }
 0xfcc   :  { %v1521_v59 = vpop.f32.mrb[42].mxu1 }
 0xfcd   :  { %v1527_v62 = vadd.f32 %v1525_v39, %v1519_v58  ;;  %v1522_v63 = vadd.f32 %v1521_v59, %v1455_v56  ;;  %v1789_v3 = vpop.f32.mrb[43].mxu1 }
 0xfcf   :  { %1529 = vst.msk [vmem:[#allocation7] sm:$0xff] %vm83_vm0, %v1527_v62  ;;  %v1528_v4 = vadd.f32 %v1526_v2, %v1522_v63 }
 0xfd1   :  { %1530 = vst.msk [vmem:[#allocation7 + $0x8] sm:$0xff] %vm83_vm0, %v1528_v4 }
 0xfd2   :  { %1986 = shalt.err (!%p1983_p6)
}
 0xfd3   :  { %s1987_s26 = scalar_lea.hbm %s2362_s2, 256 }
 0xfd4   :  { %p1988_p7 = scmp.ne.s32.totalorder %s2362_s2, %s1987_s26  ;;  %p1991_p8 = scmp.lt.u32.totalorder %s1987_s26, %s2362_s2 }
 0xfd6   :  { %p1993_p9 = pnand %p1991_p8, %p1988_p7 }
 0xfd8   :  { %1996 = shalt.err (!%p1993_p9)
}
 0xfd9   :  { %1542 = dma.vmem_to_hbm [thread:$0]  %s1537_s22, 256, %s2362_s2, [#allocation4], %s2004_s19, %s2004_s19, %s2005_s20  }
 0xfda   :  { %2001 = dma.done.wait [#allocation4], 256  }
 0xfdb   :  { %2002 = vsyncadd [#allocation4], 4294967040 }
 0xfdc   :  { %1546 = vsyncpa [#allocation3], 1 }
 0xfdd   :  { %1547 = vsyncpa [#allocation6], 1 }
 0xfde   :  { %1548 = vsyncpa [#allocation4], 1 }

</bundles_post_ra>
